<compile_context>
chip_gen: v5e
topology: v5e:2x2
jax: 0.10.0
libtpu: 0.0.40
codegen_flags: <defaults>
</compile_context>

<pallas_src>
import functools

import jax
import jax.numpy as jnp
from jax.experimental import pallas as pl
from jax.experimental.pallas import tpu as pltpu


# ----------------------------------------------------------------------------
# Model configuration
# ----------------------------------------------------------------------------
IN_CH = 3
OUT_CH = 1
T = 4                                   # temporal slots in y_i
BB_CHANNELS = [IN_CH, 8, 16, 32, 32]    # backbone stage channels (hx1..hx4)

_VMEM_LIMIT = 32 * 1024 * 1024          # safe on v5e/v6e/v7x (<= physical VMEM)


# ----------------------------------------------------------------------------
# Pallas kernel 1: fused  [M,K]@[K,N] (bf16 MXU)  + bias + relu6/sigmoid
# ----------------------------------------------------------------------------
def _mm_bias_act_kernel(x_ref, w_ref, b_ref, o_ref, *, act):
    acc = jnp.dot(x_ref[...], w_ref[...], preferred_element_type=jnp.float32)
    acc = acc + b_ref[...]                       # (1, N) f32 broadcast
    if act == "relu6":
        acc = jnp.clip(acc, 0.0, 6.0)
    elif act == "sigmoid":
        acc = jax.nn.sigmoid(acc)
    o_ref[...] = acc.astype(o_ref.dtype)


def matmul_bias_act(x, w, b, act="none", tile_m=256):
    """x: [M, K] bf16, w: [K, N] bf16, b: [1, N] f32 -> [M, N] f32.

    Tiled over M (double-buffered, 'parallel' so v7x can shard across its two
    TensorCores); weights/bias resident across the grid.
    """
    M, K = x.shape
    N = w.shape[1]
    tm = tile_m if (M % tile_m == 0) else M
    grid = (M // tm,)
    return pl.pallas_call(
        functools.partial(_mm_bias_act_kernel, act=act),
        out_shape=jax.ShapeDtypeStruct((M, N), jnp.float32),
        grid_spec=pltpu.PrefetchScalarGridSpec(
            num_scalar_prefetch=0,
            grid=grid,
            in_specs=[
                pl.BlockSpec((tm, K), lambda i: (i, 0)),
                pl.BlockSpec((K, N), lambda i: (0, 0)),
                pl.BlockSpec((1, N), lambda i: (0, 0)),
            ],
            out_specs=pl.BlockSpec((tm, N), lambda i: (i, 0)),
        ),
        compiler_params=pltpu.CompilerParams(
            dimension_semantics=("parallel",),
            vmem_limit_bytes=_VMEM_LIMIT,
        ),
    )(x, w, b)


# ----------------------------------------------------------------------------
# Pallas kernel 2: decoder 1x1 conv (N=1) as VPU/XLU reduction + fused sigmoid
#   x_t: [K, M]  (K = C*T contraction dim on sublanes, M = B*h*w on lanes)
#   outputs: raw d (1, M) and sigmoid(d) (1, M)  — lane-dense stores.
# ----------------------------------------------------------------------------
def _decoder_kernel(x_ref, w_ref, b_ref, raw_ref, sig_ref):
    d = jnp.sum(x_ref[...] * w_ref[...], axis=0, keepdims=True) + b_ref[0]
    raw_ref[...] = d
    sig_ref[...] = jax.nn.sigmoid(d)


def decoder_1x1(y_nctHW, w_col, b):
    """y: [B, C, T, h, w] f32; w_col: [C*T, 1] f32; b: [1] f32 (SMEM)."""
    B, C, Tt, h, w = y_nctHW.shape
    K, M = C * Tt, B * h * w
    # flatten (C, T) C-major / T-minor (matches torch .view(B, C*T, h, w)),
    # contraction dim first so the kernel output is lane-dense.
    x_t = jnp.transpose(y_nctHW, (1, 2, 0, 3, 4)).reshape(K, M)
    raw, sig = pl.pallas_call(
        _decoder_kernel,
        out_shape=(jax.ShapeDtypeStruct((1, M), jnp.float32),
                   jax.ShapeDtypeStruct((1, M), jnp.float32)),
        in_specs=[
            pl.BlockSpec(memory_space=pltpu.MemorySpace.VMEM),
            pl.BlockSpec(memory_space=pltpu.MemorySpace.VMEM),
            pl.BlockSpec(memory_space=pltpu.MemorySpace.SMEM),
        ],
        out_specs=(pl.BlockSpec(memory_space=pltpu.MemorySpace.VMEM),
                   pl.BlockSpec(memory_space=pltpu.MemorySpace.VMEM)),
    )(x_t, w_col, b)
    return raw.reshape(B, 1, h, w), sig.reshape(B, 1, h, w)


# ----------------------------------------------------------------------------
# Pallas kernel 3: fused head — outconv (4 -> 1 via scalar weighted sum on the
# VPU) + sigmoid, scalar weights/bias in SMEM. Replaces the N=1 MXU matmul and
# the standalone sigmoid launch.
# ----------------------------------------------------------------------------
def _head_kernel(d1_ref, d2_ref, d3_ref, d4_ref, w_ref, b_ref, o_ref):
    acc = (w_ref[0] * d1_ref[...] + w_ref[1] * d2_ref[...]
           + w_ref[2] * d3_ref[...] + w_ref[3] * d4_ref[...] + b_ref[0])
    o_ref[...] = jax.nn.sigmoid(acc)


def fused_outconv_sigmoid(raw_up, out_w, out_b):
    B, _, H, W = raw_up[0].shape
    total = B * H * W
    shp2 = (total // 128, 128) if total % 128 == 0 else (B * H, W)  # lane-dense
    flats = [u.reshape(shp2) for u in raw_up]
    o = pl.pallas_call(
        _head_kernel,
        out_shape=jax.ShapeDtypeStruct(shp2, jnp.float32),
        in_specs=[pl.BlockSpec(memory_space=pltpu.MemorySpace.VMEM)] * 4
                 + [pl.BlockSpec(memory_space=pltpu.MemorySpace.SMEM)] * 2,
        out_specs=pl.BlockSpec(memory_space=pltpu.MemorySpace.VMEM),
    )(*flats, out_w, out_b)
    return o.reshape(B, 1, H, W)


# ----------------------------------------------------------------------------
# Backbone conv (3x3, stride 2, pad 1) — NHWC, JAX im2col + Pallas fused matmul
# ----------------------------------------------------------------------------
def conv3x3_s2_relu6(x_nhwc, wm, b):
    """x: [B, H, W, Cin] f32; wm: [9*Cin, Cout] bf16 (rows ordered di,dj,cin);
    b: [1, Cout] f32."""
    B, H, W, C = x_nhwc.shape
    Ho = (H + 2 - 3) // 2 + 1
    Wo = (W + 2 - 3) // 2 + 1
    xp = jnp.pad(x_nhwc, ((0, 0), (1, 1), (1, 1), (0, 0)))
    cols = [xp[:, di:di + 2 * Ho:2, dj:dj + 2 * Wo:2, :]
            for di in range(3) for dj in range(3)]
    patches = jnp.concatenate(cols, axis=-1).reshape(B * Ho * Wo, 9 * C)
    out = matmul_bias_act(patches.astype(jnp.bfloat16), wm, b, act="relu6")
    return out.reshape(B, Ho, Wo, wm.shape[1])


def upsample_nearest(x_nchw, factor):
    if factor == 1:
        return x_nchw
    return jnp.repeat(jnp.repeat(x_nchw, factor, axis=2), factor, axis=3)


# ----------------------------------------------------------------------------
# Parameters (deterministic synthetic init, stored in kernel-friendly layout)
# ----------------------------------------------------------------------------
def init_params(key):
    params = {}
    keys = jax.random.split(key, 2 * (4 + 4 + 1))
    ki = 0

    def nrm(k, shape, scale):
        return scale * jax.random.normal(k, shape, dtype=jnp.float32)

    # backbone: 4 strided 3x3 convs; weight already as [9*Cin, Cout] bf16
    for i in range(4):
        cin, cout = BB_CHANNELS[i], BB_CHANNELS[i + 1]
        params[f"bb{i}_w"] = nrm(keys[ki], (9 * cin, cout), 0.1).astype(jnp.bfloat16); ki += 1
        params[f"bb{i}_b"] = nrm(keys[ki], (1, cout), 0.01); ki += 1
    # decoders: 1x1 conv over (C_i * T) -> OUT_CH, stored as [K, 1] column
    for i in range(4):
        k_dim = BB_CHANNELS[i + 1] * T
        params[f"dec{i + 1}_w"] = nrm(keys[ki], (k_dim, OUT_CH), 0.1); ki += 1
        params[f"dec{i + 1}_b"] = nrm(keys[ki], (OUT_CH,), 0.01); ki += 1
    # outconv: 1x1 conv over 4*OUT_CH -> OUT_CH, stored as scalar vector
    params["out_w"] = nrm(keys[ki], (4 * OUT_CH,), 0.1); ki += 1
    params["out_b"] = nrm(keys[ki], (OUT_CH,), 0.01); ki += 1
    return params


# ----------------------------------------------------------------------------
# MTSM forward
# ----------------------------------------------------------------------------
def mtsm_forward(params, x, y_1, y_2, y_3, y_4):
    assert OUT_CH == 1
    B, _, H_full, W_full = x.shape

    # backbone: NHWC end-to-end; hx1..hx4 at H/2, H/4, H/8, H/16
    h = jnp.transpose(x, (0, 2, 3, 1))          # single boundary transpose
    ys = [y_1, y_2, y_3, y_4]
    new_ys = []
    for i in range(4):
        h = conv3x3_s2_relu6(h, params[f"bb{i}_w"], params[f"bb{i}_b"])
        hx_nchw = jnp.transpose(h, (0, 3, 1, 2))        # only for the y slot write
        new_ys.append(ys[i].at[:, :, 0].set(hx_nchw))   # y_i[:, :, 0, :, :] = hx_i
    y_1, y_2, y_3, y_4 = new_ys

    # decoders: fused 1x1-conv + sigmoid (sigmoid before nearest upsample is
    # bit-identical to after); raw maps kept for the outconv.
    raw_up, sig_full = [], []
    for i, y in enumerate((y_1, y_2, y_3, y_4)):
        raw_s, sig_s = decoder_1x1(y, params[f"dec{i + 1}_w"], params[f"dec{i + 1}_b"])
        f = H_full // y.shape[3]
        raw_up.append(upsample_nearest(raw_s, f))
        sig_full.append(upsample_nearest(sig_s, f))

    # fused outconv (4 -> 1) + sigmoid
    sig_d0 = fused_outconv_sigmoid(raw_up, params["out_w"], params["out_b"])

    return (y_1, y_2, y_3, y_4,
            sig_d0, sig_full[0], sig_full[1], sig_full[2], sig_full[3])


# ----------------------------------------------------------------------------
if __name__ == "__main__":
    B, H, W = 2, 32, 32
    key = jax.random.PRNGKey(0)
    k_p, k_x, k1, k2, k3, k4 = jax.random.split(key, 6)

    params = init_params(k_p)
    x = jax.random.normal(k_x, (B, IN_CH, H, W), dtype=jnp.float32)
    y_1 = jax.random.normal(k1, (B, BB_CHANNELS[1], T, H // 2, W // 2), dtype=jnp.float32)
    y_2 = jax.random.normal(k2, (B, BB_CHANNELS[2], T, H // 4, W // 4), dtype=jnp.float32)
    y_3 = jax.random.normal(k3, (B, BB_CHANNELS[3], T, H // 8, W // 8), dtype=jnp.float32)
    y_4 = jax.random.normal(k4, (B, BB_CHANNELS[4], T, H // 16, W // 16), dtype=jnp.float32)

    fwd = jax.jit(mtsm_forward)
    outs = fwd(params, x, y_1, y_2, y_3, y_4)
    outs = jax.block_until_ready(outs)

    # light sanity checks
    assert outs[0].shape == y_1.shape
    assert outs[1].shape == y_2.shape
    assert outs[2].shape == y_3.shape
    assert outs[3].shape == y_4.shape
    assert outs[4].shape == (B, OUT_CH, H, W)
    assert all(o.shape == (B, OUT_CH, H, W) for o in outs[4:])
    assert all(float(jnp.min(o)) >= 0.0 and float(jnp.max(o)) <= 1.0 for o in outs[4:])
    print("KERNEL_OK")
</pallas_src>

<mosaic_0001>
module attributes {stable_mosaic.version = 11 : i64} {
  func.func @_mm_bias_act_kernel(%arg0: i32, %arg1: memref<256x27xbf16, #tpu.memory_space<vmem>>, %arg2: memref<27x8xbf16, #tpu.memory_space<vmem>>, %arg3: memref<1x8xf32, #tpu.memory_space<vmem>>, %arg4: memref<256x8xf32, #tpu.memory_space<vmem>>) attributes {dimension_semantics = [#tpu.dimension_semantics<parallel>], iteration_bounds = array<i64: 2>, scalar_prefetch = 0 : i64, scratch_operands = 0 : i64, tpu.core_type = #tpu.core_type<tc>, window_params = [{transform_indices = @transform_0, window_bounds = array<i64: 256, 27>}, {pipeline_mode = #tpu.pipeline_mode<synchronous>, transform_indices = @transform_1, window_bounds = array<i64: 27, 8>}, {pipeline_mode = #tpu.pipeline_mode<synchronous>, transform_indices = @transform_2, window_bounds = array<i64: 1, 8>}, {transform_indices = @transform_3, window_bounds = array<i64: 256, 8>}]} {
    %c0 = arith.constant 0 : index
    %c0_0 = arith.constant 0 : index
    %0 = vector.load %arg1[%c0, %c0_0] : memref<256x27xbf16, #tpu.memory_space<vmem>>, vector<256x27xbf16>
    %c0_1 = arith.constant 0 : index
    %c0_2 = arith.constant 0 : index
    %1 = vector.load %arg2[%c0_1, %c0_2] : memref<27x8xbf16, #tpu.memory_space<vmem>>, vector<27x8xbf16>
    %cst = arith.constant dense<0.000000e+00> : vector<256x8xf32>
    %2 = tpu.matmul %0, %1, %cst {dimension_numbers = #tpu.dot_dimension_numbers<[1], [0], [0], [1], [0, 0, 1, 1], [], []>} : vector<256x27xbf16>, vector<27x8xbf16>, vector<256x8xf32> -> vector<256x8xf32>
    %c0_3 = arith.constant 0 : index
    %c0_4 = arith.constant 0 : index
    %3 = vector.load %arg3[%c0_3, %c0_4] : memref<1x8xf32, #tpu.memory_space<vmem>>, vector<1x8xf32>
    %4 = vector.broadcast %3 : vector<1x8xf32> to vector<256x8xf32>
    %5 = arith.addf %2, %4 : vector<256x8xf32>
    %cst_5 = arith.constant 0.000000e+00 : f32
    %cst_6 = arith.constant 6.000000e+00 : f32
    %6 = vector.broadcast %cst_5 : f32 to vector<256x8xf32>
    %7 = arith.maximumf %6, %5 : vector<256x8xf32>
    %8 = vector.broadcast %cst_6 : f32 to vector<256x8xf32>
    %9 = arith.minimumf %8, %7 : vector<256x8xf32>
    %c0_7 = arith.constant 0 : index
    %c0_8 = arith.constant 0 : index
    %10 = vector.load %arg4[%c0_7, %c0_8] : memref<256x8xf32, #tpu.memory_space<vmem>>, vector<256x8xf32>
    tpu.vector_store %arg4[%c0_7, %c0_8], %9 {strides = array<i32>} : memref<256x8xf32, #tpu.memory_space<vmem>>, vector<256x8xf32>,
    return
  }
  func.func @transform_0(%arg0: i32) -> (i32, i32) {
    %c0_i32 = arith.constant 0 : i32
    %c0_i32_0 = arith.constant 0 : i32
    return %arg0, %c0_i32 : i32, i32
  }
  func.func @transform_1(%arg0: i32) -> (i32, i32) {
    %c0_i32 = arith.constant 0 : i32
    %c0_i32_0 = arith.constant 0 : i32
    %c0_i32_1 = arith.constant 0 : i32
    return %c0_i32, %c0_i32_0 : i32, i32
  }
  func.func @transform_2(%arg0: i32) -> (i32, i32) {
    %c0_i32 = arith.constant 0 : i32
    %c0_i32_0 = arith.constant 0 : i32
    %c0_i32_1 = arith.constant 0 : i32
    return %c0_i32, %c0_i32_0 : i32, i32
  }
  func.func @transform_3(%arg0: i32) -> (i32, i32) {
    %c0_i32 = arith.constant 0 : i32
    %c0_i32_0 = arith.constant 0 : i32
    return %arg0, %c0_i32 : i32, i32
  }
}

module attributes {stable_mosaic.version = 11 : i64} {
  func.func @_mm_bias_act_kernel(%arg0: i32, %arg1: memref<128x72xbf16, #tpu.memory_space<vmem>>, %arg2: memref<72x16xbf16, #tpu.memory_space<vmem>>, %arg3: memref<1x16xf32, #tpu.memory_space<vmem>>, %arg4: memref<128x16xf32, #tpu.memory_space<vmem>>) attributes {dimension_semantics = [#tpu.dimension_semantics<parallel>], iteration_bounds = array<i64: 1>, scalar_prefetch = 0 : i64, scratch_operands = 0 : i64, tpu.core_type = #tpu.core_type<tc>, window_params = [{transform_indices = @transform_0, window_bounds = array<i64: 128, 72>}, {pipeline_mode = #tpu.pipeline_mode<synchronous>, transform_indices = @transform_1, window_bounds = array<i64: 72, 16>}, {pipeline_mode = #tpu.pipeline_mode<synchronous>, transform_indices = @transform_2, window_bounds = array<i64: 1, 16>}, {transform_indices = @transform_3, window_bounds = array<i64: 128, 16>}]} {
    %c0 = arith.constant 0 : index
    %c0_0 = arith.constant 0 : index
    %0 = vector.load %arg1[%c0, %c0_0] : memref<128x72xbf16, #tpu.memory_space<vmem>>, vector<128x72xbf16>
    %c0_1 = arith.constant 0 : index
    %c0_2 = arith.constant 0 : index
    %1 = vector.load %arg2[%c0_1, %c0_2] : memref<72x16xbf16, #tpu.memory_space<vmem>>, vector<72x16xbf16>
    %cst = arith.constant dense<0.000000e+00> : vector<128x16xf32>
    %2 = tpu.matmul %0, %1, %cst {dimension_numbers = #tpu.dot_dimension_numbers<[1], [0], [0], [1], [0, 0, 1, 1], [], []>} : vector<128x72xbf16>, vector<72x16xbf16>, vector<128x16xf32> -> vector<128x16xf32>
    %c0_3 = arith.constant 0 : index
    %c0_4 = arith.constant 0 : index
    %3 = vector.load %arg3[%c0_3, %c0_4] : memref<1x16xf32, #tpu.memory_space<vmem>>, vector<1x16xf32>
    %4 = vector.broadcast %3 : vector<1x16xf32> to vector<128x16xf32>
    %5 = arith.addf %2, %4 : vector<128x16xf32>
    %cst_5 = arith.constant 0.000000e+00 : f32
    %cst_6 = arith.constant 6.000000e+00 : f32
    %6 = vector.broadcast %cst_5 : f32 to vector<128x16xf32>
    %7 = arith.maximumf %6, %5 : vector<128x16xf32>
    %8 = vector.broadcast %cst_6 : f32 to vector<128x16xf32>
    %9 = arith.minimumf %8, %7 : vector<128x16xf32>
    %c0_7 = arith.constant 0 : index
    %c0_8 = arith.constant 0 : index
    %10 = vector.load %arg4[%c0_7, %c0_8] : memref<128x16xf32, #tpu.memory_space<vmem>>, vector<128x16xf32>
    tpu.vector_store %arg4[%c0_7, %c0_8], %9 {strides = array<i32>} : memref<128x16xf32, #tpu.memory_space<vmem>>, vector<128x16xf32>,
    return
  }
  func.func @transform_0(%arg0: i32) -> (i32, i32) {
    %c0_i32 = arith.constant 0 : i32
    %c0_i32_0 = arith.constant 0 : i32
    return %arg0, %c0_i32 : i32, i32
  }
  func.func @transform_1(%arg0: i32) -> (i32, i32) {
    %c0_i32 = arith.constant 0 : i32
    %c0_i32_0 = arith.constant 0 : i32
    %c0_i32_1 = arith.constant 0 : i32
    return %c0_i32, %c0_i32_0 : i32, i32
  }
  func.func @transform_2(%arg0: i32) -> (i32, i32) {
    %c0_i32 = arith.constant 0 : i32
    %c0_i32_0 = arith.constant 0 : i32
    %c0_i32_1 = arith.constant 0 : i32
    return %c0_i32, %c0_i32_0 : i32, i32
  }
  func.func @transform_3(%arg0: i32) -> (i32, i32) {
    %c0_i32 = arith.constant 0 : i32
    %c0_i32_0 = arith.constant 0 : i32
    return %arg0, %c0_i32 : i32, i32
  }
}

module attributes {stable_mosaic.version = 11 : i64} {
  func.func @_mm_bias_act_kernel(%arg0: i32, %arg1: memref<32x144xbf16, #tpu.memory_space<vmem>>, %arg2: memref<144x32xbf16, #tpu.memory_space<vmem>>, %arg3: memref<1x32xf32, #tpu.memory_space<vmem>>, %arg4: memref<32x32xf32, #tpu.memory_space<vmem>>) attributes {dimension_semantics = [#tpu.dimension_semantics<parallel>], iteration_bounds = array<i64: 1>, scalar_prefetch = 0 : i64, scratch_operands = 0 : i64, tpu.core_type = #tpu.core_type<tc>, window_params = [{transform_indices = @transform_0, window_bounds = array<i64: 32, 144>}, {pipeline_mode = #tpu.pipeline_mode<synchronous>, transform_indices = @transform_1, window_bounds = array<i64: 144, 32>}, {pipeline_mode = #tpu.pipeline_mode<synchronous>, transform_indices = @transform_2, window_bounds = array<i64: 1, 32>}, {transform_indices = @transform_3, window_bounds = array<i64: 32, 32>}]} {
    %c0 = arith.constant 0 : index
    %c0_0 = arith.constant 0 : index
    %0 = vector.load %arg1[%c0, %c0_0] : memref<32x144xbf16, #tpu.memory_space<vmem>>, vector<32x144xbf16>
    %c0_1 = arith.constant 0 : index
    %c0_2 = arith.constant 0 : index
    %1 = vector.load %arg2[%c0_1, %c0_2] : memref<144x32xbf16, #tpu.memory_space<vmem>>, vector<144x32xbf16>
    %cst = arith.constant dense<0.000000e+00> : vector<32x32xf32>
    %2 = tpu.matmul %0, %1, %cst {dimension_numbers = #tpu.dot_dimension_numbers<[1], [0], [0], [1], [0, 0, 1, 1], [], []>} : vector<32x144xbf16>, vector<144x32xbf16>, vector<32x32xf32> -> vector<32x32xf32>
    %c0_3 = arith.constant 0 : index
    %c0_4 = arith.constant 0 : index
    %3 = vector.load %arg3[%c0_3, %c0_4] : memref<1x32xf32, #tpu.memory_space<vmem>>, vector<1x32xf32>
    %4 = vector.broadcast %3 : vector<1x32xf32> to vector<32x32xf32>
    %5 = arith.addf %2, %4 : vector<32x32xf32>
    %cst_5 = arith.constant 0.000000e+00 : f32
    %cst_6 = arith.constant 6.000000e+00 : f32
    %6 = vector.broadcast %cst_5 : f32 to vector<32x32xf32>
    %7 = arith.maximumf %6, %5 : vector<32x32xf32>
    %8 = vector.broadcast %cst_6 : f32 to vector<32x32xf32>
    %9 = arith.minimumf %8, %7 : vector<32x32xf32>
    %c0_7 = arith.constant 0 : index
    %c0_8 = arith.constant 0 : index
    %10 = vector.load %arg4[%c0_7, %c0_8] : memref<32x32xf32, #tpu.memory_space<vmem>>, vector<32x32xf32>
    tpu.vector_store %arg4[%c0_7, %c0_8], %9 {strides = array<i32>} : memref<32x32xf32, #tpu.memory_space<vmem>>, vector<32x32xf32>,
    return
  }
  func.func @transform_0(%arg0: i32) -> (i32, i32) {
    %c0_i32 = arith.constant 0 : i32
    %c0_i32_0 = arith.constant 0 : i32
    return %arg0, %c0_i32 : i32, i32
  }
  func.func @transform_1(%arg0: i32) -> (i32, i32) {
    %c0_i32 = arith.constant 0 : i32
    %c0_i32_0 = arith.constant 0 : i32
    %c0_i32_1 = arith.constant 0 : i32
    return %c0_i32, %c0_i32_0 : i32, i32
  }
  func.func @transform_2(%arg0: i32) -> (i32, i32) {
    %c0_i32 = arith.constant 0 : i32
    %c0_i32_0 = arith.constant 0 : i32
    %c0_i32_1 = arith.constant 0 : i32
    return %c0_i32, %c0_i32_0 : i32, i32
  }
  func.func @transform_3(%arg0: i32) -> (i32, i32) {
    %c0_i32 = arith.constant 0 : i32
    %c0_i32_0 = arith.constant 0 : i32
    return %arg0, %c0_i32 : i32, i32
  }
}

module attributes {stable_mosaic.version = 11 : i64} {
  func.func @_mm_bias_act_kernel(%arg0: i32, %arg1: memref<8x288xbf16, #tpu.memory_space<vmem>>, %arg2: memref<288x32xbf16, #tpu.memory_space<vmem>>, %arg3: memref<1x32xf32, #tpu.memory_space<vmem>>, %arg4: memref<8x32xf32, #tpu.memory_space<vmem>>) attributes {dimension_semantics = [#tpu.dimension_semantics<parallel>], iteration_bounds = array<i64: 1>, scalar_prefetch = 0 : i64, scratch_operands = 0 : i64, tpu.core_type = #tpu.core_type<tc>, window_params = [{transform_indices = @transform_0, window_bounds = array<i64: 8, 288>}, {pipeline_mode = #tpu.pipeline_mode<synchronous>, transform_indices = @transform_1, window_bounds = array<i64: 288, 32>}, {pipeline_mode = #tpu.pipeline_mode<synchronous>, transform_indices = @transform_2, window_bounds = array<i64: 1, 32>}, {transform_indices = @transform_3, window_bounds = array<i64: 8, 32>}]} {
    %c0 = arith.constant 0 : index
    %c0_0 = arith.constant 0 : index
    %0 = vector.load %arg1[%c0, %c0_0] : memref<8x288xbf16, #tpu.memory_space<vmem>>, vector<8x288xbf16>
    %c0_1 = arith.constant 0 : index
    %c0_2 = arith.constant 0 : index
    %1 = vector.load %arg2[%c0_1, %c0_2] : memref<288x32xbf16, #tpu.memory_space<vmem>>, vector<288x32xbf16>
    %cst = arith.constant dense<0.000000e+00> : vector<8x32xf32>
    %2 = tpu.matmul %0, %1, %cst {dimension_numbers = #tpu.dot_dimension_numbers<[1], [0], [0], [1], [0, 0, 1, 1], [], []>} : vector<8x288xbf16>, vector<288x32xbf16>, vector<8x32xf32> -> vector<8x32xf32>
    %c0_3 = arith.constant 0 : index
    %c0_4 = arith.constant 0 : index
    %3 = vector.load %arg3[%c0_3, %c0_4] : memref<1x32xf32, #tpu.memory_space<vmem>>, vector<1x32xf32>
    %4 = vector.broadcast %3 : vector<1x32xf32> to vector<8x32xf32>
    %5 = arith.addf %2, %4 : vector<8x32xf32>
    %cst_5 = arith.constant 0.000000e+00 : f32
    %cst_6 = arith.constant 6.000000e+00 : f32
    %6 = vector.broadcast %cst_5 : f32 to vector<8x32xf32>
    %7 = arith.maximumf %6, %5 : vector<8x32xf32>
    %8 = vector.broadcast %cst_6 : f32 to vector<8x32xf32>
    %9 = arith.minimumf %8, %7 : vector<8x32xf32>
    %c0_7 = arith.constant 0 : index
    %c0_8 = arith.constant 0 : index
    %10 = vector.load %arg4[%c0_7, %c0_8] : memref<8x32xf32, #tpu.memory_space<vmem>>, vector<8x32xf32>
    tpu.vector_store %arg4[%c0_7, %c0_8], %9 {strides = array<i32>} : memref<8x32xf32, #tpu.memory_space<vmem>>, vector<8x32xf32>,
    return
  }
  func.func @transform_0(%arg0: i32) -> (i32, i32) {
    %c0_i32 = arith.constant 0 : i32
    %c0_i32_0 = arith.constant 0 : i32
    return %arg0, %c0_i32 : i32, i32
  }
  func.func @transform_1(%arg0: i32) -> (i32, i32) {
    %c0_i32 = arith.constant 0 : i32
    %c0_i32_0 = arith.constant 0 : i32
    %c0_i32_1 = arith.constant 0 : i32
    return %c0_i32, %c0_i32_0 : i32, i32
  }
  func.func @transform_2(%arg0: i32) -> (i32, i32) {
    %c0_i32 = arith.constant 0 : i32
    %c0_i32_0 = arith.constant 0 : i32
    %c0_i32_1 = arith.constant 0 : i32
    return %c0_i32, %c0_i32_0 : i32, i32
  }
  func.func @transform_3(%arg0: i32) -> (i32, i32) {
    %c0_i32 = arith.constant 0 : i32
    %c0_i32_0 = arith.constant 0 : i32
    return %arg0, %c0_i32 : i32, i32
  }
}

module attributes {stable_mosaic.version = 11 : i64} {
  func.func @_decoder_kernel(%arg0: memref<32x512xf32, #tpu.memory_space<vmem>>, %arg1: memref<32x1xf32, #tpu.memory_space<vmem>>, %arg2: memref<1xf32, #tpu.memory_space<smem>>, %arg3: memref<1x512xf32, #tpu.memory_space<vmem>>, %arg4: memref<1x512xf32, #tpu.memory_space<vmem>>) attributes {dimension_semantics = [], scalar_prefetch = 0 : i64, scratch_operands = 0 : i64, tpu.core_type = #tpu.core_type<tc>} {
    %c0 = arith.constant 0 : index
    %c0_0 = arith.constant 0 : index
    %0 = vector.load %arg0[%c0, %c0_0] : memref<32x512xf32, #tpu.memory_space<vmem>>, vector<32x512xf32>
    %c0_1 = arith.constant 0 : index
    %c0_2 = arith.constant 0 : index
    %1 = vector.load %arg1[%c0_1, %c0_2] : memref<32x1xf32, #tpu.memory_space<vmem>>, vector<32x1xf32>
    %2 = vector.broadcast %1 : vector<32x1xf32> to vector<32x512xf32>
    %3 = arith.mulf %0, %2 : vector<32x512xf32>
    %cst = arith.constant dense<0.000000e+00> : vector<512xf32>
    %4 = vector.multi_reduction <add>, %3, %cst [0] : vector<32x512xf32> to vector<512xf32>
    %5 = vector.shape_cast %4 : vector<512xf32> to vector<1x512xf32>
    %c0_3 = arith.constant 0 : index
    %6 = memref.load %arg2[%c0_3] : memref<1xf32, #tpu.memory_space<smem>>
    %7 = vector.broadcast %6 : f32 to vector<1x512xf32>
    %8 = arith.addf %5, %7 : vector<1x512xf32>
    %c0_4 = arith.constant 0 : index
    %c0_5 = arith.constant 0 : index
    %9 = vector.load %arg3[%c0_4, %c0_5] : memref<1x512xf32, #tpu.memory_space<vmem>>, vector<1x512xf32>
    tpu.vector_store %arg3[%c0_4, %c0_5], %8 {strides = array<i32>} : memref<1x512xf32, #tpu.memory_space<vmem>>, vector<1x512xf32>,
    %10 = arith.negf %8 : vector<1x512xf32>
    %11 = math.exp %10 : vector<1x512xf32>
    %cst_6 = arith.constant 1.000000e+00 : f32
    %12 = vector.broadcast %cst_6 : f32 to vector<1x512xf32>
    %13 = arith.addf %12, %11 : vector<1x512xf32>
    %14 = arith.divf %12, %13 : vector<1x512xf32>
    %c0_7 = arith.constant 0 : index
    %c0_8 = arith.constant 0 : index
    %15 = vector.load %arg4[%c0_7, %c0_8] : memref<1x512xf32, #tpu.memory_space<vmem>>, vector<1x512xf32>
    tpu.vector_store %arg4[%c0_7, %c0_8], %14 {strides = array<i32>} : memref<1x512xf32, #tpu.memory_space<vmem>>, vector<1x512xf32>,
    return
  }
}

module attributes {stable_mosaic.version = 11 : i64} {
  func.func @_decoder_kernel(%arg0: memref<64x128xf32, #tpu.memory_space<vmem>>, %arg1: memref<64x1xf32, #tpu.memory_space<vmem>>, %arg2: memref<1xf32, #tpu.memory_space<smem>>, %arg3: memref<1x128xf32, #tpu.memory_space<vmem>>, %arg4: memref<1x128xf32, #tpu.memory_space<vmem>>) attributes {dimension_semantics = [], scalar_prefetch = 0 : i64, scratch_operands = 0 : i64, tpu.core_type = #tpu.core_type<tc>} {
    %c0 = arith.constant 0 : index
    %c0_0 = arith.constant 0 : index
    %0 = vector.load %arg0[%c0, %c0_0] : memref<64x128xf32, #tpu.memory_space<vmem>>, vector<64x128xf32>
    %c0_1 = arith.constant 0 : index
    %c0_2 = arith.constant 0 : index
    %1 = vector.load %arg1[%c0_1, %c0_2] : memref<64x1xf32, #tpu.memory_space<vmem>>, vector<64x1xf32>
    %2 = vector.broadcast %1 : vector<64x1xf32> to vector<64x128xf32>
    %3 = arith.mulf %0, %2 : vector<64x128xf32>
    %cst = arith.constant dense<0.000000e+00> : vector<128xf32>
    %4 = vector.multi_reduction <add>, %3, %cst [0] : vector<64x128xf32> to vector<128xf32>
    %5 = vector.shape_cast %4 : vector<128xf32> to vector<1x128xf32>
    %c0_3 = arith.constant 0 : index
    %6 = memref.load %arg2[%c0_3] : memref<1xf32, #tpu.memory_space<smem>>
    %7 = vector.broadcast %6 : f32 to vector<1x128xf32>
    %8 = arith.addf %5, %7 : vector<1x128xf32>
    %c0_4 = arith.constant 0 : index
    %c0_5 = arith.constant 0 : index
    %9 = vector.load %arg3[%c0_4, %c0_5] : memref<1x128xf32, #tpu.memory_space<vmem>>, vector<1x128xf32>
    tpu.vector_store %arg3[%c0_4, %c0_5], %8 {strides = array<i32>} : memref<1x128xf32, #tpu.memory_space<vmem>>, vector<1x128xf32>,
    %10 = arith.negf %8 : vector<1x128xf32>
    %11 = math.exp %10 : vector<1x128xf32>
    %cst_6 = arith.constant 1.000000e+00 : f32
    %12 = vector.broadcast %cst_6 : f32 to vector<1x128xf32>
    %13 = arith.addf %12, %11 : vector<1x128xf32>
    %14 = arith.divf %12, %13 : vector<1x128xf32>
    %c0_7 = arith.constant 0 : index
    %c0_8 = arith.constant 0 : index
    %15 = vector.load %arg4[%c0_7, %c0_8] : memref<1x128xf32, #tpu.memory_space<vmem>>, vector<1x128xf32>
    tpu.vector_store %arg4[%c0_7, %c0_8], %14 {strides = array<i32>} : memref<1x128xf32, #tpu.memory_space<vmem>>, vector<1x128xf32>,
    return
  }
}

module attributes {stable_mosaic.version = 11 : i64} {
  func.func @_decoder_kernel(%arg0: memref<128x32xf32, #tpu.memory_space<vmem>>, %arg1: memref<128x1xf32, #tpu.memory_space<vmem>>, %arg2: memref<1xf32, #tpu.memory_space<smem>>, %arg3: memref<1x32xf32, #tpu.memory_space<vmem>>, %arg4: memref<1x32xf32, #tpu.memory_space<vmem>>) attributes {dimension_semantics = [], scalar_prefetch = 0 : i64, scratch_operands = 0 : i64, tpu.core_type = #tpu.core_type<tc>} {
    %c0 = arith.constant 0 : index
    %c0_0 = arith.constant 0 : index
    %0 = vector.load %arg0[%c0, %c0_0] : memref<128x32xf32, #tpu.memory_space<vmem>>, vector<128x32xf32>
    %c0_1 = arith.constant 0 : index
    %c0_2 = arith.constant 0 : index
    %1 = vector.load %arg1[%c0_1, %c0_2] : memref<128x1xf32, #tpu.memory_space<vmem>>, vector<128x1xf32>
    %2 = vector.broadcast %1 : vector<128x1xf32> to vector<128x32xf32>
    %3 = arith.mulf %0, %2 : vector<128x32xf32>
    %cst = arith.constant dense<0.000000e+00> : vector<32xf32>
    %4 = vector.multi_reduction <add>, %3, %cst [0] : vector<128x32xf32> to vector<32xf32>
    %5 = vector.shape_cast %4 : vector<32xf32> to vector<1x32xf32>
    %c0_3 = arith.constant 0 : index
    %6 = memref.load %arg2[%c0_3] : memref<1xf32, #tpu.memory_space<smem>>
    %7 = vector.broadcast %6 : f32 to vector<1x32xf32>
    %8 = arith.addf %5, %7 : vector<1x32xf32>
    %c0_4 = arith.constant 0 : index
    %c0_5 = arith.constant 0 : index
    %9 = vector.load %arg3[%c0_4, %c0_5] : memref<1x32xf32, #tpu.memory_space<vmem>>, vector<1x32xf32>
    tpu.vector_store %arg3[%c0_4, %c0_5], %8 {strides = array<i32>} : memref<1x32xf32, #tpu.memory_space<vmem>>, vector<1x32xf32>,
    %10 = arith.negf %8 : vector<1x32xf32>
    %11 = math.exp %10 : vector<1x32xf32>
    %cst_6 = arith.constant 1.000000e+00 : f32
    %12 = vector.broadcast %cst_6 : f32 to vector<1x32xf32>
    %13 = arith.addf %12, %11 : vector<1x32xf32>
    %14 = arith.divf %12, %13 : vector<1x32xf32>
    %c0_7 = arith.constant 0 : index
    %c0_8 = arith.constant 0 : index
    %15 = vector.load %arg4[%c0_7, %c0_8] : memref<1x32xf32, #tpu.memory_space<vmem>>, vector<1x32xf32>
    tpu.vector_store %arg4[%c0_7, %c0_8], %14 {strides = array<i32>} : memref<1x32xf32, #tpu.memory_space<vmem>>, vector<1x32xf32>,
    return
  }
}

module attributes {stable_mosaic.version = 11 : i64} {
  func.func @_decoder_kernel(%arg0: memref<128x8xf32, #tpu.memory_space<vmem>>, %arg1: memref<128x1xf32, #tpu.memory_space<vmem>>, %arg2: memref<1xf32, #tpu.memory_space<smem>>, %arg3: memref<1x8xf32, #tpu.memory_space<vmem>>, %arg4: memref<1x8xf32, #tpu.memory_space<vmem>>) attributes {dimension_semantics = [], scalar_prefetch = 0 : i64, scratch_operands = 0 : i64, tpu.core_type = #tpu.core_type<tc>} {
    %c0 = arith.constant 0 : index
    %c0_0 = arith.constant 0 : index
    %0 = vector.load %arg0[%c0, %c0_0] : memref<128x8xf32, #tpu.memory_space<vmem>>, vector<128x8xf32>
    %c0_1 = arith.constant 0 : index
    %c0_2 = arith.constant 0 : index
    %1 = vector.load %arg1[%c0_1, %c0_2] : memref<128x1xf32, #tpu.memory_space<vmem>>, vector<128x1xf32>
    %2 = vector.broadcast %1 : vector<128x1xf32> to vector<128x8xf32>
    %3 = arith.mulf %0, %2 : vector<128x8xf32>
    %cst = arith.constant dense<0.000000e+00> : vector<8xf32>
    %4 = vector.multi_reduction <add>, %3, %cst [0] : vector<128x8xf32> to vector<8xf32>
    %5 = vector.shape_cast %4 : vector<8xf32> to vector<1x8xf32>
    %c0_3 = arith.constant 0 : index
    %6 = memref.load %arg2[%c0_3] : memref<1xf32, #tpu.memory_space<smem>>
    %7 = vector.broadcast %6 : f32 to vector<1x8xf32>
    %8 = arith.addf %5, %7 : vector<1x8xf32>
    %c0_4 = arith.constant 0 : index
    %c0_5 = arith.constant 0 : index
    %9 = vector.load %arg3[%c0_4, %c0_5] : memref<1x8xf32, #tpu.memory_space<vmem>>, vector<1x8xf32>
    tpu.vector_store %arg3[%c0_4, %c0_5], %8 {strides = array<i32>} : memref<1x8xf32, #tpu.memory_space<vmem>>, vector<1x8xf32>,
    %10 = arith.negf %8 : vector<1x8xf32>
    %11 = math.exp %10 : vector<1x8xf32>
    %cst_6 = arith.constant 1.000000e+00 : f32
    %12 = vector.broadcast %cst_6 : f32 to vector<1x8xf32>
    %13 = arith.addf %12, %11 : vector<1x8xf32>
    %14 = arith.divf %12, %13 : vector<1x8xf32>
    %c0_7 = arith.constant 0 : index
    %c0_8 = arith.constant 0 : index
    %15 = vector.load %arg4[%c0_7, %c0_8] : memref<1x8xf32, #tpu.memory_space<vmem>>, vector<1x8xf32>
    tpu.vector_store %arg4[%c0_7, %c0_8], %14 {strides = array<i32>} : memref<1x8xf32, #tpu.memory_space<vmem>>, vector<1x8xf32>,
    return
  }
}

module attributes {stable_mosaic.version = 11 : i64} {
  func.func @_head_kernel(%arg0: memref<16x128xf32, #tpu.memory_space<vmem>>, %arg1: memref<16x128xf32, #tpu.memory_space<vmem>>, %arg2: memref<16x128xf32, #tpu.memory_space<vmem>>, %arg3: memref<16x128xf32, #tpu.memory_space<vmem>>, %arg4: memref<4xf32, #tpu.memory_space<smem>>, %arg5: memref<1xf32, #tpu.memory_space<smem>>, %arg6: memref<16x128xf32, #tpu.memory_space<vmem>>) attributes {dimension_semantics = [], scalar_prefetch = 0 : i64, scratch_operands = 0 : i64, tpu.core_type = #tpu.core_type<tc>} {
    %c0 = arith.constant 0 : index
    %0 = memref.load %arg4[%c0] : memref<4xf32, #tpu.memory_space<smem>>
    %c0_0 = arith.constant 0 : index
    %c0_1 = arith.constant 0 : index
    %1 = vector.load %arg0[%c0_0, %c0_1] : memref<16x128xf32, #tpu.memory_space<vmem>>, vector<16x128xf32>
    %2 = vector.broadcast %0 : f32 to vector<16x128xf32>
    %3 = arith.mulf %2, %1 : vector<16x128xf32>
    %c1 = arith.constant 1 : index
    %4 = memref.load %arg4[%c1] : memref<4xf32, #tpu.memory_space<smem>>
    %c0_2 = arith.constant 0 : index
    %c0_3 = arith.constant 0 : index
    %5 = vector.load %arg1[%c0_2, %c0_3] : memref<16x128xf32, #tpu.memory_space<vmem>>, vector<16x128xf32>
    %6 = vector.broadcast %4 : f32 to vector<16x128xf32>
    %7 = arith.mulf %6, %5 : vector<16x128xf32>
    %8 = arith.addf %3, %7 : vector<16x128xf32>
    %c2 = arith.constant 2 : index
    %9 = memref.load %arg4[%c2] : memref<4xf32, #tpu.memory_space<smem>>
    %c0_4 = arith.constant 0 : index
    %c0_5 = arith.constant 0 : index
    %10 = vector.load %arg2[%c0_4, %c0_5] : memref<16x128xf32, #tpu.memory_space<vmem>>, vector<16x128xf32>
    %11 = vector.broadcast %9 : f32 to vector<16x128xf32>
    %12 = arith.mulf %11, %10 : vector<16x128xf32>
    %13 = arith.addf %8, %12 : vector<16x128xf32>
    %c3 = arith.constant 3 : index
    %14 = memref.load %arg4[%c3] : memref<4xf32, #tpu.memory_space<smem>>
    %c0_6 = arith.constant 0 : index
    %c0_7 = arith.constant 0 : index
    %15 = vector.load %arg3[%c0_6, %c0_7] : memref<16x128xf32, #tpu.memory_space<vmem>>, vector<16x128xf32>
    %16 = vector.broadcast %14 : f32 to vector<16x128xf32>
    %17 = arith.mulf %16, %15 : vector<16x128xf32>
    %18 = arith.addf %13, %17 : vector<16x128xf32>
    %c0_8 = arith.constant 0 : index
    %19 = memref.load %arg5[%c0_8] : memref<1xf32, #tpu.memory_space<smem>>
    %20 = vector.broadcast %19 : f32 to vector<16x128xf32>
    %21 = arith.addf %18, %20 : vector<16x128xf32>
    %22 = arith.negf %21 : vector<16x128xf32>
    %23 = math.exp %22 : vector<16x128xf32>
    %cst = arith.constant 1.000000e+00 : f32
    %24 = vector.broadcast %cst : f32 to vector<16x128xf32>
    %25 = arith.addf %24, %23 : vector<16x128xf32>
    %26 = arith.divf %24, %25 : vector<16x128xf32>
    %c0_9 = arith.constant 0 : index
    %c0_10 = arith.constant 0 : index
    %27 = vector.load %arg6[%c0_9, %c0_10] : memref<16x128xf32, #tpu.memory_space<vmem>>, vector<16x128xf32>
    tpu.vector_store %arg6[%c0_9, %c0_10], %26 {strides = array<i32>} : memref<16x128xf32, #tpu.memory_space<vmem>>, vector<16x128xf32>,
    return
  }
}

</mosaic_0001>

<bundles_post_ra>
// kernel: mtsm_forward.9
= control target key start
LH: loop header
LB: loop body
LE: loop exit
PB: predicated region body
PF: predicated region fallthrough
CT: control target
= control target key end

     0   :  { %s766_s12 = smov 0   ;;  %s933_s0 = inlined_call_operand.vmem [shape: bf16[512,27], index: 0, kind: input, shape index: {}]   ;;  %s934_s1 = inlined_call_operand.vmem [shape: bf16[27,8], index: 1, kind: input, shape index: {}]   ;;  %s935_s2 = inlined_call_operand.vmem [shape: f32[1,8], index: 2, kind: input, shape index: {}]   ;;  %s936_s3 = inlined_call_operand.vmem [shape: f32[512,8], index: 3, kind: output, shape index: {}]  }
   0x1 LB: > { %s604_s13 = sadd.s32 4294967295, %s743_s12   ;;  %p608_p0 = scmp.ge.s32.totalorder %s743_s12, 1  ;;  %s743_s12 = sphi %s766_s12, %s13_s12  }
   0x2   : > { %p138_p1 = scmp.lt.s32.totalorder %s743_s12, 3 }
   0x4   : > { %p139_p2 = pnand %p608_p0, %p138_p1 }
   0x5   : > { %s609_s18 = sshll.u32 (!%p139_p2), %s604_s13, 5 }
   0x6   : > { %142 = sbr.rel (%p139_p2) target bundleno = 221 (0xdd), region = 32  ;;  %p163_p3 = scmp.lt.s32.totalorder (!%p139_p2), %s609_s18, 63 }
   0xb   : > { %v683_v0 = vld [vmem:[%s934_s1 + $0x8] sm:$0xf]  ;;  %v720_v1 = vld [vmem:[%s934_s1 + $0x8] sm:$0x30]  ;;  %vm355_vm0 = vcmask 1044480   ;;  %vm356_vm1 = vcmask 1045504  }
   0xc   : > { %v684_v2 = vor.u32 %v720_v1, %v683_v0  ;;  %v745_v3 = vmov 65535   ;;  %s938_s18 = smov (!%p163_p3, %s609_s18), 63  ;;  %v719_v7 = vld [vmem:[%s934_s1] sm:$0xff]  ;;  %vm306_vm2 = vcmask 220160   ;;  %vm515_vm3 = vcmask 64512  }
   0xd   : > { %v357_v4 = vsel %vm355_vm0, 4294967295, %v745_v3  ;;  %s610_s21 = sshll.u32 %s938_s18, 2  ;;  %v826_v24 = vld [vmem:[%s935_s2] ss:$0 sm:$0xff]  ;;  %s612_s27 = sshll.u32 %s938_s18, 3 }
   0xe   : > { %v358_v5 = vsel %vm356_vm1, %v357_v4, 0  ;;  %s789_s24 = scalar_lea.vmem %s933_s0, %s610_s21  ;;  %s834_s30 = scalar_lea.vmem %s936_s3, %s612_s27 }
   0xf   : > { %v360_v6 = vand.u32 %v684_v2, %v358_v5  ;;  %v703_v8 = vld [vmem:[%s789_s24] sm:$0xff]  ;;  %v704_v12 = vld [vmem:[%s789_s24 + $0x8] sm:$0xff]  ;;  %v705_v16 = vld [vmem:[%s789_s24 + $0x10] sm:$0xff] }
  0x10   : > { %v707_v9 = vld [vmem:[%s789_s24 + $0x20] sm:$0xff]  ;;  %v708_v13 = vld [vmem:[%s789_s24 + $0x28] sm:$0xff]  ;;  %v709_v17 = vld [vmem:[%s789_s24 + $0x30] sm:$0xff] }
  0x11   : > { %368 = vmatpush.bf16.msra.mxu0 %v360_v6  ;;  %721 = vmatpush.bf16.msra.mxu1 %v360_v6  ;;  %v711_v10 = vld [vmem:[%s789_s24 + $0x40] sm:$0xff]  ;;  %v712_v14 = vld [vmem:[%s789_s24 + $0x48] sm:$0xff]  ;;  %v713_v18 = vld [vmem:[%s789_s24 + $0x50] sm:$0xff] }
  0x12   : > { %722 = vmatpush.bf16.msra.mxu2 %v360_v6  ;;  %723 = vmatpush.bf16.msra.mxu3 %v360_v6  ;;  %v715_v11 = vld [vmem:[%s789_s24 + $0x60] sm:$0xff]  ;;  %v716_v15 = vld [vmem:[%s789_s24 + $0x68] sm:$0xff]  ;;  %v717_v19 = vld [vmem:[%s789_s24 + $0x70] sm:$0xff] }
  0x13   : > { %v706_v20 = vld [vmem:[%s789_s24 + $0x18] sm:$0xff] }
  0x14   : > { %v710_v21 = vld [vmem:[%s789_s24 + $0x38] sm:$0xff] }
  0x15   : > { %369 = vmatpush.bf16.msra.mxu0 %v719_v7  ;;  %724 = vmatpush.bf16.msra.mxu1 %v719_v7  ;;  %v714_v22 = vld [vmem:[%s789_s24 + $0x58] sm:$0xff] }
  0x16   : > { %725 = vmatpush.bf16.msra.mxu2 %v719_v7  ;;  %726 = vmatpush.bf16.msra.mxu3 %v719_v7  ;;  %v718_v23 = vld [vmem:[%s789_s24 + $0x78] sm:$0xff] }
  0x18   : > { %685 = vmatmul.msk.bf16.vlgmr.msra.gmra.mxu0 %vm306_vm2, %v703_v8  ;;  %689 = vmatmul.msk.bf16.vlgmr.msra.gmra.mxu1 %vm306_vm2, %v707_v9 }
  0x19   : > { %693 = vmatmul.msk.bf16.vlgmr.msra.gmra.mxu2 %vm306_vm2, %v711_v10  ;;  %697 = vmatmul.msk.bf16.vlgmr.msra.gmra.mxu3 %vm306_vm2, %v715_v11 }
  0x28   : > { %686 = vmatmul.msk.bf16.gmra.mxu0 %vm306_vm2, %v704_v12  ;;  %690 = vmatmul.msk.bf16.gmra.mxu1 %vm306_vm2, %v708_v13 }
  0x29   : > { %694 = vmatmul.msk.bf16.gmra.mxu2 %vm306_vm2, %v712_v14  ;;  %698 = vmatmul.msk.bf16.gmra.mxu3 %vm306_vm2, %v716_v15 }
  0x38   : > { %687 = vmatmul.msk.bf16.gmra.mxu0 %vm306_vm2, %v705_v16  ;;  %691 = vmatmul.msk.bf16.gmra.mxu1 %vm306_vm2, %v709_v17 }
  0x39   : > { %695 = vmatmul.msk.bf16.gmra.mxu2 %vm306_vm2, %v713_v18  ;;  %699 = vmatmul.msk.bf16.gmra.mxu3 %vm306_vm2, %v717_v19 }
  0x48   : > { %688 = vmatmul.msk.bf16.gmra.mxu0 %vm306_vm2, %v706_v20  ;;  %692 = vmatmul.msk.bf16.gmra.mxu1 %vm306_vm2, %v710_v21 }
  0x49   : > { %696 = vmatmul.msk.bf16.gmra.mxu2 %vm306_vm2, %v714_v22  ;;  %700 = vmatmul.msk.bf16.gmra.mxu3 %vm306_vm2, %v718_v23 }
  0x95   : > { %v371_v25 = vpop.f32.mrf.mxu0  ;;  %v391_v26 = vpop.f32.mrf.mxu1 }
  0x96   : > { %v372_v27 = vadd.f32 %v826_v24, %v371_v25  ;;  %v392_v28 = vadd.f32 %v826_v24, %v391_v26 }
  0x98   : > { %v451_v29 = vmax.f32 %v372_v27, 0.0  ;;  %v459_v30 = vmax.f32 %v392_v28, 0.0 }
  0x9a   : > { %v483_v31 = vmin.f32 %v451_v29, 6.0  ;;  %v491_v32 = vmin.f32 %v459_v30, 6.0 }
  0x9c   : > { %516 = vst.msk [vmem:[%s834_s30] sm:$0xff] %vm515_vm3, %v483_v31  ;;  %v411_v33 = vpop.f32.mrf.mxu2  ;;  %v431_v34 = vpop.f32.mrf.mxu3 }
  0x9d   : > { %524 = vst.msk [vmem:[%s834_s30 + $0x40] sm:$0xff] %vm515_vm3, %v491_v32  ;;  %v412_v35 = vadd.f32 %v826_v24, %v411_v33  ;;  %v432_v36 = vadd.f32 %v826_v24, %v431_v34  ;;  %v373_v37 = vpop.f32.mrf.mxu0  ;;  %v393_v38 = vpop.f32.mrf.mxu1 }
  0x9e   : > { %v374_v39 = vadd.f32 %v826_v24, %v373_v37  ;;  %v394_v40 = vadd.f32 %v826_v24, %v393_v38 }
  0x9f   : > { %v467_v41 = vmax.f32 %v412_v35, 0.0  ;;  %v475_v42 = vmax.f32 %v432_v36, 0.0 }
  0xa0   : > { %v452_v43 = vmax.f32 %v374_v39, 0.0  ;;  %v460_v44 = vmax.f32 %v394_v40, 0.0 }
  0xa1   : > { %v499_v45 = vmin.f32 %v467_v41, 6.0  ;;  %v507_v46 = vmin.f32 %v475_v42, 6.0 }
  0xa2   : > { %v484_v47 = vmin.f32 %v452_v43, 6.0  ;;  %v492_v48 = vmin.f32 %v460_v44, 6.0 }
  0xa3   : > { %532 = vst.msk [vmem:[%s834_s30 + $0x80] sm:$0xff] %vm515_vm3, %v499_v45 }
  0xa4   : > { %540 = vst.msk [vmem:[%s834_s30 + $0xc0] sm:$0xff] %vm515_vm3, %v507_v46  ;;  %v413_v49 = vpop.f32.mrf.mxu2  ;;  %v433_v50 = vpop.f32.mrf.mxu3 }
  0xa5   : > { %517 = vst.msk [vmem:[%s834_s30 + $0x8] sm:$0xff] %vm515_vm3, %v484_v47  ;;  %v414_v51 = vadd.f32 %v826_v24, %v413_v49  ;;  %v434_v52 = vadd.f32 %v826_v24, %v433_v50  ;;  %v376_v53 = vpop.f32.mrf.mxu0  ;;  %v396_v54 = vpop.f32.mrf.mxu1 }
  0xa6   : > { %525 = vst.msk [vmem:[%s834_s30 + $0x48] sm:$0xff] %vm515_vm3, %v492_v48  ;;  %v377_v55 = vadd.f32 %v826_v24, %v376_v53  ;;  %v397_v56 = vadd.f32 %v826_v24, %v396_v54 }
  0xa7   : > { %v468_v57 = vmax.f32 %v414_v51, 0.0  ;;  %v476_v58 = vmax.f32 %v434_v52, 0.0 }
  0xa8   : > { %v453_v59 = vmax.f32 %v377_v55, 0.0  ;;  %v461_v60 = vmax.f32 %v397_v56, 0.0 }
  0xa9   : > { %v500_v61 = vmin.f32 %v468_v57, 6.0  ;;  %v508_v62 = vmin.f32 %v476_v58, 6.0 }
  0xaa   : > { %v485_v63 = vmin.f32 %v453_v59, 6.0  ;;  %v493_v0 = vmin.f32 %v461_v60, 6.0 }
  0xab   : > { %533 = vst.msk [vmem:[%s834_s30 + $0x88] sm:$0xff] %vm515_vm3, %v500_v61 }
  0xac   : > { %541 = vst.msk [vmem:[%s834_s30 + $0xc8] sm:$0xff] %vm515_vm3, %v508_v62  ;;  %v416_v1 = vpop.f32.mrf.mxu2  ;;  %v436_v2 = vpop.f32.mrf.mxu3 }
  0xad   : > { %518 = vst.msk [vmem:[%s834_s30 + $0x10] sm:$0xff] %vm515_vm3, %v485_v63  ;;  %v417_v3 = vadd.f32 %v826_v24, %v416_v1  ;;  %v437_v4 = vadd.f32 %v826_v24, %v436_v2  ;;  %v378_v5 = vpop.f32.mrf.mxu0  ;;  %v398_v6 = vpop.f32.mrf.mxu1 }
  0xae   : > { %526 = vst.msk [vmem:[%s834_s30 + $0x50] sm:$0xff] %vm515_vm3, %v493_v0  ;;  %v379_v7 = vadd.f32 %v826_v24, %v378_v5  ;;  %v399_v8 = vadd.f32 %v826_v24, %v398_v6 }
  0xaf   : > { %v469_v9 = vmax.f32 %v417_v3, 0.0  ;;  %v477_v10 = vmax.f32 %v437_v4, 0.0 }
  0xb0   : > { %v454_v11 = vmax.f32 %v379_v7, 0.0  ;;  %v462_v12 = vmax.f32 %v399_v8, 0.0 }
  0xb1   : > { %v501_v13 = vmin.f32 %v469_v9, 6.0  ;;  %v509_v14 = vmin.f32 %v477_v10, 6.0 }
  0xb2   : > { %v486_v15 = vmin.f32 %v454_v11, 6.0  ;;  %v494_v16 = vmin.f32 %v462_v12, 6.0 }
  0xb3   : > { %534 = vst.msk [vmem:[%s834_s30 + $0x90] sm:$0xff] %vm515_vm3, %v501_v13 }
  0xb4   : > { %542 = vst.msk [vmem:[%s834_s30 + $0xd0] sm:$0xff] %vm515_vm3, %v509_v14  ;;  %v418_v17 = vpop.f32.mrf.mxu2  ;;  %v438_v18 = vpop.f32.mrf.mxu3 }
  0xb5   : > { %519 = vst.msk [vmem:[%s834_s30 + $0x18] sm:$0xff] %vm515_vm3, %v486_v15  ;;  %v419_v19 = vadd.f32 %v826_v24, %v418_v17  ;;  %v439_v20 = vadd.f32 %v826_v24, %v438_v18  ;;  %v381_v21 = vpop.f32.mrf.mxu0  ;;  %v401_v22 = vpop.f32.mrf.mxu1 }
  0xb6   : > { %527 = vst.msk [vmem:[%s834_s30 + $0x58] sm:$0xff] %vm515_vm3, %v494_v16  ;;  %v382_v23 = vadd.f32 %v826_v24, %v381_v21  ;;  %v402_v25 = vadd.f32 %v826_v24, %v401_v22 }
  0xb7   : > { %v470_v26 = vmax.f32 %v419_v19, 0.0  ;;  %v478_v27 = vmax.f32 %v439_v20, 0.0 }
  0xb8   : > { %v455_v28 = vmax.f32 %v382_v23, 0.0  ;;  %v463_v29 = vmax.f32 %v402_v25, 0.0 }
  0xb9   : > { %v502_v30 = vmin.f32 %v470_v26, 6.0  ;;  %v510_v31 = vmin.f32 %v478_v27, 6.0 }
  0xba   : > { %v487_v32 = vmin.f32 %v455_v28, 6.0  ;;  %v495_v33 = vmin.f32 %v463_v29, 6.0 }
  0xbb   : > { %535 = vst.msk [vmem:[%s834_s30 + $0x98] sm:$0xff] %vm515_vm3, %v502_v30 }
  0xbc   : > { %543 = vst.msk [vmem:[%s834_s30 + $0xd8] sm:$0xff] %vm515_vm3, %v510_v31  ;;  %v421_v34 = vpop.f32.mrf.mxu2  ;;  %v441_v35 = vpop.f32.mrf.mxu3 }
  0xbd   : > { %520 = vst.msk [vmem:[%s834_s30 + $0x20] sm:$0xff] %vm515_vm3, %v487_v32  ;;  %v422_v36 = vadd.f32 %v826_v24, %v421_v34  ;;  %v442_v37 = vadd.f32 %v826_v24, %v441_v35  ;;  %v383_v38 = vpop.f32.mrf.mxu0  ;;  %v403_v39 = vpop.f32.mrf.mxu1 }
  0xbe   : > { %528 = vst.msk [vmem:[%s834_s30 + $0x60] sm:$0xff] %vm515_vm3, %v495_v33  ;;  %v384_v40 = vadd.f32 %v826_v24, %v383_v38  ;;  %v404_v41 = vadd.f32 %v826_v24, %v403_v39 }
  0xbf   : > { %v471_v42 = vmax.f32 %v422_v36, 0.0  ;;  %v479_v43 = vmax.f32 %v442_v37, 0.0 }
  0xc0   : > { %v456_v44 = vmax.f32 %v384_v40, 0.0  ;;  %v464_v45 = vmax.f32 %v404_v41, 0.0 }
  0xc1   : > { %v503_v46 = vmin.f32 %v471_v42, 6.0  ;;  %v511_v47 = vmin.f32 %v479_v43, 6.0 }
  0xc2   : > { %v488_v48 = vmin.f32 %v456_v44, 6.0  ;;  %v496_v49 = vmin.f32 %v464_v45, 6.0 }
  0xc3   : > { %536 = vst.msk [vmem:[%s834_s30 + $0xa0] sm:$0xff] %vm515_vm3, %v503_v46 }
  0xc4   : > { %544 = vst.msk [vmem:[%s834_s30 + $0xe0] sm:$0xff] %vm515_vm3, %v511_v47  ;;  %v423_v50 = vpop.f32.mrf.mxu2  ;;  %v443_v51 = vpop.f32.mrf.mxu3 }
  0xc5   : > { %521 = vst.msk [vmem:[%s834_s30 + $0x28] sm:$0xff] %vm515_vm3, %v488_v48  ;;  %v424_v52 = vadd.f32 %v826_v24, %v423_v50  ;;  %v444_v53 = vadd.f32 %v826_v24, %v443_v51  ;;  %v386_v54 = vpop.f32.mrf.mxu0  ;;  %v406_v55 = vpop.f32.mrf.mxu1 }
  0xc6   : > { %529 = vst.msk [vmem:[%s834_s30 + $0x68] sm:$0xff] %vm515_vm3, %v496_v49  ;;  %v387_v56 = vadd.f32 %v826_v24, %v386_v54  ;;  %v407_v57 = vadd.f32 %v826_v24, %v406_v55 }
  0xc7   : > { %v472_v58 = vmax.f32 %v424_v52, 0.0  ;;  %v480_v59 = vmax.f32 %v444_v53, 0.0 }
  0xc8   : > { %v457_v60 = vmax.f32 %v387_v56, 0.0  ;;  %v465_v61 = vmax.f32 %v407_v57, 0.0 }
  0xc9   : > { %v504_v62 = vmin.f32 %v472_v58, 6.0  ;;  %v512_v63 = vmin.f32 %v480_v59, 6.0 }
  0xca   : > { %v489_v0 = vmin.f32 %v457_v60, 6.0  ;;  %v497_v1 = vmin.f32 %v465_v61, 6.0 }
  0xcb   : > { %537 = vst.msk [vmem:[%s834_s30 + $0xa8] sm:$0xff] %vm515_vm3, %v504_v62 }
  0xcc   : > { %545 = vst.msk [vmem:[%s834_s30 + $0xe8] sm:$0xff] %vm515_vm3, %v512_v63  ;;  %v426_v2 = vpop.f32.mrf.mxu2  ;;  %v446_v3 = vpop.f32.mrf.mxu3 }
  0xcd   : > { %522 = vst.msk [vmem:[%s834_s30 + $0x30] sm:$0xff] %vm515_vm3, %v489_v0  ;;  %v427_v4 = vadd.f32 %v826_v24, %v426_v2  ;;  %v447_v5 = vadd.f32 %v826_v24, %v446_v3  ;;  %v388_v6 = vpop.f32.mrf.mxu0  ;;  %v408_v7 = vpop.f32.mrf.mxu1 }
  0xce   : > { %530 = vst.msk [vmem:[%s834_s30 + $0x70] sm:$0xff] %vm515_vm3, %v497_v1  ;;  %v389_v8 = vadd.f32 %v826_v24, %v388_v6  ;;  %v409_v9 = vadd.f32 %v826_v24, %v408_v7 }
  0xcf   : > { %v473_v10 = vmax.f32 %v427_v4, 0.0  ;;  %v481_v11 = vmax.f32 %v447_v5, 0.0 }
  0xd0   : > { %v458_v12 = vmax.f32 %v389_v8, 0.0  ;;  %v466_v13 = vmax.f32 %v409_v9, 0.0 }
  0xd1   : > { %v505_v14 = vmin.f32 %v473_v10, 6.0  ;;  %v513_v15 = vmin.f32 %v481_v11, 6.0 }
  0xd2   : > { %v490_v16 = vmin.f32 %v458_v12, 6.0  ;;  %v498_v17 = vmin.f32 %v466_v13, 6.0 }
  0xd3   : > { %538 = vst.msk [vmem:[%s834_s30 + $0xb0] sm:$0xff] %vm515_vm3, %v505_v14 }
  0xd4   : > { %546 = vst.msk [vmem:[%s834_s30 + $0xf0] sm:$0xff] %vm515_vm3, %v513_v15  ;;  %v428_v18 = vpop.f32.mrf.mxu2  ;;  %v448_v19 = vpop.f32.mrf.mxu3 }
  0xd5   : > { %523 = vst.msk [vmem:[%s834_s30 + $0x38] sm:$0xff] %vm515_vm3, %v490_v16  ;;  %v429_v20 = vadd.f32 %v826_v24, %v428_v18  ;;  %v449_v21 = vadd.f32 %v826_v24, %v448_v19 }
  0xd6   : > { %531 = vst.msk [vmem:[%s834_s30 + $0x78] sm:$0xff] %vm515_vm3, %v498_v17 }
  0xd7   : > { %v474_v22 = vmax.f32 %v429_v20, 0.0  ;;  %v482_v23 = vmax.f32 %v449_v21, 0.0 }
  0xd9   : > { %v506_v25 = vmin.f32 %v474_v22, 6.0  ;;  %v514_v26 = vmin.f32 %v482_v23, 6.0 }
  0xdb   : > { %539 = vst.msk [vmem:[%s834_s30 + $0xb8] sm:$0xff] %vm515_vm3, %v506_v25 }
  0xdc   : > { %547 = vst.msk [vmem:[%s834_s30 + $0xf8] sm:$0xff] %vm515_vm3, %v514_v26 }
  0xdd PF: > { %s13_s12 = sadd.s32 1, %s743_s12  }
  0xde   : > { %p10_p4 = scmp.ge.s32.totalorder %s13_s12, 4  }
  0xe0   :  { %12 = sbr.rel (!%p10_p4) target bundleno = 1 (0x1), region = 62 }

// kernel: mtsm_forward.10
= control target key start
LH: loop header
LB: loop body
LE: loop exit
PB: predicated region body
PF: predicated region fallthrough
CT: control target
= control target key end

     0   :  { %vm136_vm0 = vcmask 1043456   ;;  %vm111_vm1 = vcmask 588800   ;;  %vm221_vm2 = vcmask 130048   ;;  %s478_s1 = inlined_call_operand.vmem [shape: bf16[72,16], index: 1, kind: input, shape index: {}]   ;;  %s479_s2 = inlined_call_operand.vmem [shape: f32[1,16], index: 2, kind: input, shape index: {}]   ;;  %s480_s0 = inlined_call_operand.vmem [shape: bf16[128,72], index: 0, kind: input, shape index: {}]   ;;  %s481_s3 = inlined_call_operand.vmem [shape: f32[128,16], index: 3, kind: output, shape index: {}]  }
   0x1   :  { %v39_v0 = vld [vmem:[%s478_s1 + $0x20] sm:$0xf]  ;;  %v309_v4 = vld [vmem:[%s478_s1 + $0x18] sm:$0xff]  ;;  %v308_v5 = vld [vmem:[%s478_s1 + $0x10] sm:$0xff] }
   0x2   :  { %v101_v1 = vunpack.c.l.b16 %v39_v0  ;;  %v307_v6 = vld [vmem:[%s478_s1 + $0x8] sm:$0xff]  ;;  %v306_v7 = vld [vmem:[%s478_s1] sm:$0xff]  ;;  %v300_v9 = vld [vmem:[%s480_s0 + $0x10] sm:$0xff] }
   0x3   :  { %v298_v8 = vld [vmem:[%s480_s0] sm:$0xff]  ;;  %v304_v11 = vld [vmem:[%s480_s0 + $0x30] sm:$0xff]  ;;  %v299_v12 = vld [vmem:[%s480_s0 + $0x8] sm:$0xff] }
   0x4   :  { %v106_v2 = vpack.c.b16 %v101_v1, %v101_v1  ;;  %v302_v10 = vld [vmem:[%s480_s0 + $0x20] sm:$0xff]  ;;  %v301_v13 = vld [vmem:[%s480_s0 + $0x18] sm:$0xff]  ;;  %v303_v14 = vld [vmem:[%s480_s0 + $0x28] sm:$0xff] }
   0x5   :  { %v305_v15 = vld [vmem:[%s480_s0 + $0x38] sm:$0xff]  ;;  %v396_v16 = vld [vmem:[%s479_s2] ss:$0 sm:$0xff] }
   0x6   :  { %v138_v3 = vsel %vm136_vm0, %v106_v2, 0 }
   0x7   :  { %143 = vmatpush.bf16.msra.mxu0 %v138_v3  ;;  %310 = vmatpush.bf16.msra.mxu1 %v138_v3 }
   0x8   :  { %311 = vmatpush.bf16.msra.mxu2 %v138_v3  ;;  %312 = vmatpush.bf16.msra.mxu3 %v138_v3 }
   0xb   :  { %144 = vmatpush.bf16.msra.mxu0 %v309_v4  ;;  %313 = vmatpush.bf16.msra.mxu1 %v309_v4 }
   0xc   :  { %314 = vmatpush.bf16.msra.mxu2 %v309_v4  ;;  %315 = vmatpush.bf16.msra.mxu3 %v309_v4 }
   0xf   :  { %145 = vmatpush.bf16.msra.mxu0 %v308_v5  ;;  %316 = vmatpush.bf16.msra.mxu1 %v308_v5 }
  0x10   :  { %317 = vmatpush.bf16.msra.mxu2 %v308_v5  ;;  %318 = vmatpush.bf16.msra.mxu3 %v308_v5 }
  0x13   :  { %146 = vmatpush.bf16.msra.mxu0 %v307_v6  ;;  %319 = vmatpush.bf16.msra.mxu1 %v307_v6 }
  0x14   :  { %320 = vmatpush.bf16.msra.mxu2 %v307_v6  ;;  %321 = vmatpush.bf16.msra.mxu3 %v307_v6 }
  0x17   :  { %147 = vmatpush.bf16.msra.mxu0 %v306_v7  ;;  %322 = vmatpush.bf16.msra.mxu1 %v306_v7 }
  0x18   :  { %323 = vmatpush.bf16.msra.mxu2 %v306_v7  ;;  %324 = vmatpush.bf16.msra.mxu3 %v306_v7 }
  0x1a   :  { %290 = vmatmul.msk.bf16.vlgmr.msra.gmra.mxu0 %vm111_vm1, %v298_v8  ;;  %292 = vmatmul.msk.bf16.vlgmr.msra.gmra.mxu1 %vm111_vm1, %v300_v9 }
  0x1b   :  { %294 = vmatmul.msk.bf16.vlgmr.msra.gmra.mxu2 %vm111_vm1, %v302_v10  ;;  %296 = vmatmul.msk.bf16.vlgmr.msra.gmra.mxu3 %vm111_vm1, %v304_v11 }
  0x2a   :  { %291 = vmatmul.msk.bf16.gmra.mxu0 %vm111_vm1, %v299_v12  ;;  %293 = vmatmul.msk.bf16.gmra.mxu1 %vm111_vm1, %v301_v13 }
  0x2b   :  { %295 = vmatmul.msk.bf16.gmra.mxu2 %vm111_vm1, %v303_v14  ;;  %297 = vmatmul.msk.bf16.gmra.mxu3 %vm111_vm1, %v305_v15 }
  0x97   :  { %v149_v17 = vpop.f32.mrf.mxu0  ;;  %v159_v18 = vpop.f32.mrf.mxu1 }
  0x98   :  { %v150_v19 = vadd.f32 %v396_v16, %v149_v17  ;;  %v160_v20 = vadd.f32 %v396_v16, %v159_v18 }
  0x9a   :  { %v189_v21 = vmax.f32 %v150_v19, 0.0  ;;  %v193_v22 = vmax.f32 %v160_v20, 0.0 }
  0x9c   :  { %v205_v23 = vmin.f32 %v189_v21, 6.0  ;;  %v209_v24 = vmin.f32 %v193_v22, 6.0 }
  0x9e   :  { %222 = vst.msk [vmem:[%s481_s3] sm:$0xff] %vm221_vm2, %v205_v23  ;;  %v169_v25 = vpop.f32.mrf.mxu2  ;;  %v179_v26 = vpop.f32.mrf.mxu3 }
  0x9f   :  { %226 = vst.msk [vmem:[%s481_s3 + $0x20] sm:$0xff] %vm221_vm2, %v209_v24  ;;  %v170_v27 = vadd.f32 %v396_v16, %v169_v25  ;;  %v180_v28 = vadd.f32 %v396_v16, %v179_v26  ;;  %v151_v29 = vpop.f32.mrf.mxu0  ;;  %v161_v30 = vpop.f32.mrf.mxu1 }
  0xa0   :  { %v152_v31 = vadd.f32 %v396_v16, %v151_v29  ;;  %v162_v32 = vadd.f32 %v396_v16, %v161_v30 }
  0xa1   :  { %v197_v33 = vmax.f32 %v170_v27, 0.0  ;;  %v201_v34 = vmax.f32 %v180_v28, 0.0 }
  0xa2   :  { %v190_v35 = vmax.f32 %v152_v31, 0.0  ;;  %v194_v36 = vmax.f32 %v162_v32, 0.0 }
  0xa3   :  { %v213_v37 = vmin.f32 %v197_v33, 6.0  ;;  %v217_v38 = vmin.f32 %v201_v34, 6.0 }
  0xa4   :  { %v206_v39 = vmin.f32 %v190_v35, 6.0  ;;  %v210_v40 = vmin.f32 %v194_v36, 6.0 }
  0xa5   :  { %230 = vst.msk [vmem:[%s481_s3 + $0x40] sm:$0xff] %vm221_vm2, %v213_v37 }
  0xa6   :  { %234 = vst.msk [vmem:[%s481_s3 + $0x60] sm:$0xff] %vm221_vm2, %v217_v38  ;;  %v171_v41 = vpop.f32.mrf.mxu2  ;;  %v181_v42 = vpop.f32.mrf.mxu3 }
  0xa7   :  { %223 = vst.msk [vmem:[%s481_s3 + $0x8] sm:$0xff] %vm221_vm2, %v206_v39  ;;  %v172_v43 = vadd.f32 %v396_v16, %v171_v41  ;;  %v182_v44 = vadd.f32 %v396_v16, %v181_v42  ;;  %v154_v45 = vpop.f32.mrf.mxu0  ;;  %v164_v46 = vpop.f32.mrf.mxu1 }
  0xa8   :  { %227 = vst.msk [vmem:[%s481_s3 + $0x28] sm:$0xff] %vm221_vm2, %v210_v40  ;;  %v155_v47 = vadd.f32 %v396_v16, %v154_v45  ;;  %v165_v48 = vadd.f32 %v396_v16, %v164_v46 }
  0xa9   :  { %v198_v49 = vmax.f32 %v172_v43, 0.0  ;;  %v202_v50 = vmax.f32 %v182_v44, 0.0 }
  0xaa   :  { %v191_v51 = vmax.f32 %v155_v47, 0.0  ;;  %v195_v52 = vmax.f32 %v165_v48, 0.0 }
  0xab   :  { %v214_v53 = vmin.f32 %v198_v49, 6.0  ;;  %v218_v54 = vmin.f32 %v202_v50, 6.0 }
  0xac   :  { %v207_v55 = vmin.f32 %v191_v51, 6.0  ;;  %v211_v56 = vmin.f32 %v195_v52, 6.0 }
  0xad   :  { %231 = vst.msk [vmem:[%s481_s3 + $0x48] sm:$0xff] %vm221_vm2, %v214_v53 }
  0xae   :  { %235 = vst.msk [vmem:[%s481_s3 + $0x68] sm:$0xff] %vm221_vm2, %v218_v54  ;;  %v174_v57 = vpop.f32.mrf.mxu2  ;;  %v184_v58 = vpop.f32.mrf.mxu3 }
  0xaf   :  { %224 = vst.msk [vmem:[%s481_s3 + $0x10] sm:$0xff] %vm221_vm2, %v207_v55  ;;  %v175_v59 = vadd.f32 %v396_v16, %v174_v57  ;;  %v185_v60 = vadd.f32 %v396_v16, %v184_v58  ;;  %v156_v61 = vpop.f32.mrf.mxu0  ;;  %v166_v62 = vpop.f32.mrf.mxu1 }
  0xb0   :  { %228 = vst.msk [vmem:[%s481_s3 + $0x30] sm:$0xff] %vm221_vm2, %v211_v56  ;;  %v157_v63 = vadd.f32 %v396_v16, %v156_v61  ;;  %v167_v0 = vadd.f32 %v396_v16, %v166_v62 }
  0xb1   :  { %v199_v1 = vmax.f32 %v175_v59, 0.0  ;;  %v203_v2 = vmax.f32 %v185_v60, 0.0 }
  0xb2   :  { %v192_v3 = vmax.f32 %v157_v63, 0.0  ;;  %v196_v4 = vmax.f32 %v167_v0, 0.0 }
  0xb3   :  { %v215_v5 = vmin.f32 %v199_v1, 6.0  ;;  %v219_v6 = vmin.f32 %v203_v2, 6.0 }
  0xb4   :  { %v208_v7 = vmin.f32 %v192_v3, 6.0  ;;  %v212_v8 = vmin.f32 %v196_v4, 6.0 }
  0xb5   :  { %232 = vst.msk [vmem:[%s481_s3 + $0x50] sm:$0xff] %vm221_vm2, %v215_v5 }
  0xb6   :  { %236 = vst.msk [vmem:[%s481_s3 + $0x70] sm:$0xff] %vm221_vm2, %v219_v6  ;;  %v176_v9 = vpop.f32.mrf.mxu2  ;;  %v186_v10 = vpop.f32.mrf.mxu3 }
  0xb7   :  { %225 = vst.msk [vmem:[%s481_s3 + $0x18] sm:$0xff] %vm221_vm2, %v208_v7  ;;  %v177_v11 = vadd.f32 %v396_v16, %v176_v9  ;;  %v187_v12 = vadd.f32 %v396_v16, %v186_v10 }
  0xb8   :  { %229 = vst.msk [vmem:[%s481_s3 + $0x38] sm:$0xff] %vm221_vm2, %v212_v8 }
  0xb9   :  { %v200_v13 = vmax.f32 %v177_v11, 0.0  ;;  %v204_v14 = vmax.f32 %v187_v12, 0.0 }
  0xbb   :  { %v216_v15 = vmin.f32 %v200_v13, 6.0  ;;  %v220_v17 = vmin.f32 %v204_v14, 6.0 }
  0xbd   :  { %233 = vst.msk [vmem:[%s481_s3 + $0x58] sm:$0xff] %vm221_vm2, %v216_v15 }
  0xbe   :  { %237 = vst.msk [vmem:[%s481_s3 + $0x78] sm:$0xff] %vm221_vm2, %v220_v17 }

// kernel: mtsm_forward.11
= control target key start
LH: loop header
LB: loop body
LE: loop exit
PB: predicated region body
PF: predicated region fallthrough
CT: control target
= control target key end

     0   :  { %vm113_vm0 = vcmask 130048   ;;  %vm166_vm1 = vcmask 261120   ;;  %s343_s1 = inlined_call_operand.vmem [shape: bf16[144,32], index: 1, kind: input, shape index: {}]   ;;  %s344_s0 = inlined_call_operand.vmem [shape: bf16[32,144], index: 0, kind: input, shape index: {}]   ;;  %s345_s2 = inlined_call_operand.vmem [shape: f32[1,32], index: 2, kind: input, shape index: {}]   ;;  %s346_s3 = inlined_call_operand.vmem [shape: f32[32,32], index: 3, kind: output, shape index: {}]  }
   0x1   :  { %v240_v0 = vld [vmem:[%s343_s1 + $0x38] sm:$0xff]  ;;  %v241_v1 = vld [vmem:[%s343_s1 + $0x40] sm:$0xff]  ;;  %v239_v3 = vld [vmem:[%s343_s1 + $0x30] sm:$0xff] }
   0x2   :  { %v229_v2 = vld [vmem:[%s344_s0 + $0x4] sm:$0xf]  ;;  %120 = vmatpush.bf16.msra.mxu0 %v240_v0  ;;  %242 = vmatpush.bf16.msra.mxu2 %v240_v0  ;;  %v179_v4 = vld [vmem:[%s344_s0 + $0x8] sm:$0xf0]  ;;  %v236_v8 = vld [vmem:[%s343_s1 + $0x18] sm:$0xff] }
   0x3   :  { %146 = vmatpush.bf16.msra.mxu1 %v241_v1  ;;  %v182_v5 = vor.u32 %v229_v2, %v179_v4  ;;  %v238_v6 = vld [vmem:[%s343_s1 + $0x28] sm:$0xff]  ;;  %v237_v7 = vld [vmem:[%s343_s1 + $0x20] sm:$0xff]  ;;  %v231_v9 = vld [vmem:[%s344_s0 + $0x14] sm:$0xf] }
   0x4   :  { %v187_v10 = vld [vmem:[%s344_s0 + $0x18] sm:$0xf0]  ;;  %v235_v11 = vld [vmem:[%s343_s1 + $0x10] sm:$0xff]  ;;  %v234_v13 = vld [vmem:[%s343_s1 + $0x8] sm:$0xff] }
   0x5   :  { %v190_v12 = vor.u32 %v231_v9, %v187_v10  ;;  %v233_v14 = vld [vmem:[%s343_s1] sm:$0xff]  ;;  %v230_v16 = vld [vmem:[%s344_s0 + $0x4] sm:$0xf0]  ;;  %v185_v17 = vld [vmem:[%s344_s0 + $0x10] sm:$0xf] }
   0x6   :  { %121 = vmatpush.bf16.msra.mxu0 %v239_v3  ;;  %243 = vmatpush.bf16.msra.mxu2 %v239_v3  ;;  %v177_v15 = vld [vmem:[%s344_s0] sm:$0xf]  ;;  %v232_v18 = vld [vmem:[%s344_s0 + $0x14] sm:$0xf0] }
   0x7   :  { %227 = vmatmul.msk.bf16.vlgmr.msra.gmra.mxu1 %vm113_vm0, %v182_v5  ;;  %v178_v19 = vor.u32 %v230_v16, %v177_v15  ;;  %v186_v20 = vor.u32 %v232_v18, %v185_v17  ;;  %v250_v23 = vld [vmem:[%s345_s2] ss:$0 sm:$0xff] }
   0xa   :  { %122 = vmatpush.bf16.msra.mxu0 %v238_v6  ;;  %244 = vmatpush.bf16.msra.mxu2 %v238_v6 }
   0xe   :  { %123 = vmatpush.bf16.msra.mxu0 %v237_v7  ;;  %245 = vmatpush.bf16.msra.mxu2 %v237_v7 }
  0x12   :  { %124 = vmatpush.bf16.msra.mxu0 %v236_v8  ;;  %246 = vmatpush.bf16.msra.mxu2 %v236_v8 }
  0x16   :  { %125 = vmatpush.bf16.msra.mxu0 %v235_v11  ;;  %247 = vmatpush.bf16.msra.mxu2 %v235_v11 }
  0x17   :  { %228 = vmatmul.msk.bf16.gmra.mxu1 %vm113_vm0, %v190_v12 }
  0x1a   :  { %126 = vmatpush.bf16.msra.mxu0 %v234_v13  ;;  %248 = vmatpush.bf16.msra.mxu2 %v234_v13 }
  0x1e   :  { %127 = vmatpush.bf16.msra.mxu0 %v233_v14  ;;  %249 = vmatpush.bf16.msra.mxu2 %v233_v14 }
  0x21   :  { %128 = vmatmul.bf16.vlgmr.msra.gmra.mxu0 %v178_v19  ;;  %133 = vmatmul.bf16.vlgmr.msra.gmra.mxu2 %v186_v20 }
  0x84   :  { %v148_v21 = vpop.f32.mrf.mxu1 }
  0x8c   :  { %v150_v22 = vpop.f32.mrf.mxu1 }
  0x94   :  { %v153_v28 = vpop.f32.mrf.mxu1 }
  0x9c   :  { %v155_v42 = vpop.f32.mrf.mxu1 }
  0x9e   :  { %v129_v24 = vpop.f32.mrf.mxu0 }
  0x9f   :  { %v130_v25 = vadd.f32 %v250_v23, %v129_v24 }
  0xa1   :  { %v149_v26 = vadd.f32 %v148_v21, %v130_v25 }
  0xa3   :  { %v158_v27 = vmax.f32 %v149_v26, 0.0 }
  0xa4   :  { %v134_v29 = vpop.f32.mrf.mxu2 }
  0xa5   :  { %v162_v30 = vmin.f32 %v158_v27, 6.0  ;;  %v135_v31 = vadd.f32 %v250_v23, %v134_v29 }
  0xa6   :  { %v131_v32 = vpop.f32.mrf.mxu0 }
  0xa7   :  { %167 = vst.msk [vmem:[%s346_s3] sm:$0xff] %vm166_vm1, %v162_v30  ;;  %v154_v33 = vadd.f32 %v153_v28, %v135_v31  ;;  %v132_v34 = vadd.f32 %v250_v23, %v131_v32 }
  0xa9   :  { %v160_v35 = vmax.f32 %v154_v33, 0.0  ;;  %v151_v36 = vadd.f32 %v150_v22, %v132_v34 }
  0xab   :  { %v164_v37 = vmin.f32 %v160_v35, 6.0  ;;  %v159_v38 = vmax.f32 %v151_v36, 0.0 }
  0xac   :  { %v136_v39 = vpop.f32.mrf.mxu2 }
  0xad   :  { %169 = vst.msk [vmem:[%s346_s3 + $0x10] sm:$0xff] %vm166_vm1, %v164_v37  ;;  %v163_v40 = vmin.f32 %v159_v38, 6.0  ;;  %v137_v41 = vadd.f32 %v250_v23, %v136_v39 }
  0xaf   :  { %168 = vst.msk [vmem:[%s346_s3 + $0x8] sm:$0xff] %vm166_vm1, %v163_v40  ;;  %v156_v43 = vadd.f32 %v155_v42, %v137_v41 }
  0xb1   :  { %v161_v44 = vmax.f32 %v156_v43, 0.0 }
  0xb3   :  { %v165_v45 = vmin.f32 %v161_v44, 6.0 }
  0xb5   :  { %170 = vst.msk [vmem:[%s346_s3 + $0x18] sm:$0xff] %vm166_vm1, %v165_v45 }

// kernel: mtsm_forward.12
= control target key start
LH: loop header
LB: loop body
LE: loop exit
PB: predicated region body
PF: predicated region fallthrough
CT: control target
= control target key end

     0   :  { %vm175_vm0 = vcmask 261120   ;;  %s405_s1 = inlined_call_operand.vmem [shape: bf16[288,32], index: 1, kind: input, shape index: {}]   ;;  %s406_s0 = inlined_call_operand.vmem [shape: bf16[8,288], index: 0, kind: input, shape index: {}]   ;;  %s407_s2 = inlined_call_operand.vmem [shape: f32[1,32], index: 2, kind: input, shape index: {}]   ;;  %s408_s3 = inlined_call_operand.vmem [shape: f32[8,32], index: 3, kind: output, shape index: {}]  }
   0x1   :  { %v305_v0 = vld [vmem:[%s405_s1 + $0x38] sm:$0xff]  ;;  %v304_v2 = vld [vmem:[%s405_s1 + $0x30] sm:$0xff]  ;;  %v315_v4 = vld [vmem:[%s405_s1 + $0x88] sm:$0xff] }
   0x2   :  { %v313_v1 = vld [vmem:[%s405_s1 + $0x78] sm:$0xff]  ;;  %179 = vmatpush.bf16.msra.mxu0 %v305_v0  ;;  %v312_v3 = vld [vmem:[%s405_s1 + $0x70] sm:$0xff]  ;;  %211 = vmatpush.bf16.msra.mxu2 %v315_v4  ;;  %v314_v5 = vld [vmem:[%s405_s1 + $0x80] sm:$0xff] }
   0x3   :  { %192 = vmatpush.bf16.msra.mxu1 %v313_v1  ;;  %v16_v6 = vld [vmem:[%s406_s0 + $0x8] sm:$0xf]  ;;  %v302_v11 = vld [vmem:[%s405_s1 + $0x20] sm:$0xff]  ;;  %v301_v13 = vld [vmem:[%s405_s1 + $0x18] sm:$0xff] }
   0x4   :  { %v61_v7 = vunpack.c.l.b16 %v16_v6  ;;  %v303_v8 = vld [vmem:[%s405_s1 + $0x28] sm:$0xff]  ;;  %v310_v12 = vld [vmem:[%s405_s1 + $0x60] sm:$0xff]  ;;  %v309_v14 = vld [vmem:[%s405_s1 + $0x58] sm:$0xff] }
   0x5   :  { %v311_v9 = vld [vmem:[%s405_s1 + $0x68] sm:$0xff]  ;;  %v300_v15 = vld [vmem:[%s405_s1 + $0x10] sm:$0xff]  ;;  %v15_v19 = vld [vmem:[%s406_s0] sm:$0xff] }
   0x6   :  { %180 = vmatpush.bf16.msra.mxu0 %v304_v2  ;;  %v64_v10 = vpack.c.b16 %v61_v7, %v61_v7  ;;  %212 = vmatpush.bf16.msra.mxu2 %v314_v5  ;;  %v308_v16 = vld [vmem:[%s405_s1 + $0x50] sm:$0xff]  ;;  %v299_v17 = vld [vmem:[%s405_s1 + $0x8] sm:$0xff]  ;;  %v59_v20 = vunpack.c.l.b16 %v15_v19  ;;  %v60_v21 = vunpack.c.h.b16 %v15_v19  ;;  %v298_v22 = vld [vmem:[%s405_s1] sm:$0xff] }
   0x7   :  { %193 = vmatpush.bf16.msra.mxu1 %v312_v3  ;;  %v307_v18 = vld [vmem:[%s405_s1 + $0x48] sm:$0xff]  ;;  %v306_v23 = vld [vmem:[%s405_s1 + $0x40] sm:$0xff] }
   0x8   :  { %v62_v24 = vpack.c.b16 %v59_v20, %v59_v20  ;;  %v63_v25 = vpack.c.b16 %v60_v21, %v60_v21  ;;  %v316_v28 = vld [vmem:[%s407_s2] ss:$0 sm:$0xff] }
   0x9   :  { %297 = vmatmul.msk.bf16.vlgmr.msra.gmra.mxu2 %vm175_vm0, %v64_v10 }
   0xa   :  { %181 = vmatpush.bf16.msra.mxu0 %v303_v8 }
   0xb   :  { %194 = vmatpush.bf16.msra.mxu1 %v311_v9 }
   0xe   :  { %182 = vmatpush.bf16.msra.mxu0 %v302_v11 }
   0xf   :  { %195 = vmatpush.bf16.msra.mxu1 %v310_v12 }
  0x12   :  { %183 = vmatpush.bf16.msra.mxu0 %v301_v13 }
  0x13   :  { %196 = vmatpush.bf16.msra.mxu1 %v309_v14 }
  0x16   :  { %184 = vmatpush.bf16.msra.mxu0 %v300_v15 }
  0x17   :  { %197 = vmatpush.bf16.msra.mxu1 %v308_v16 }
  0x1a   :  { %185 = vmatpush.bf16.msra.mxu0 %v299_v17 }
  0x1b   :  { %198 = vmatpush.bf16.msra.mxu1 %v307_v18 }
  0x1e   :  { %186 = vmatpush.bf16.msra.mxu0 %v298_v22 }
  0x1f   :  { %199 = vmatpush.bf16.msra.mxu1 %v306_v23 }
  0x21   :  { %187 = vmatmul.bf16.vlgmr.msra.gmra.mxu0 %v62_v24 }
  0x22   :  { %200 = vmatmul.bf16.vlgmr.msra.gmra.mxu1 %v63_v25 }
  0x8c   :  { %v214_v26 = vpop.f32.mrf.mxu2 }
  0x94   :  { %v216_v27 = vpop.f32.mrf.mxu2 }
  0x9e   :  { %v188_v29 = vpop.f32.mrf.mxu0 }
  0x9f   :  { %v201_v30 = vpop.f32.mrf.mxu1  ;;  %v189_v31 = vadd.f32 %v316_v28, %v188_v29 }
  0xa1   :  { %v202_v32 = vadd.f32 %v201_v30, %v189_v31 }
  0xa3   :  { %v215_v33 = vadd.f32 %v214_v26, %v202_v32 }
  0xa5   :  { %v218_v34 = vmax.f32 %v215_v33, 0.0 }
  0xa6   :  { %v190_v35 = vpop.f32.mrf.mxu0 }
  0xa7   :  { %v203_v36 = vpop.f32.mrf.mxu1  ;;  %v219_v37 = vmin.f32 %v218_v34, 6.0 }
  0xa9   :  { %220 = vst.msk [vmem:[%s408_s3] sm:$0xff] %vm175_vm0, %v219_v37 }

// kernel: mtsm_forward.13
= control target key start
LH: loop header
LB: loop body
LE: loop exit
PB: predicated region body
PF: predicated region fallthrough
CT: control target
= control target key end

     0   :  { %v253_v0 = vmov 0   ;;  %vm122_vm0 = vcmask 1040384   ;;  %vm124_vm1 = vcmask 1042434   ;;  %vm376_vm2 = vcmask 1041408   ;;  %s371_s1 = inlined_call_operand.vmem [shape: f32[32,1], index: 1, kind: input, shape index: {}]   ;;  %s372_s0 = inlined_call_operand.vmem [shape: f32[32,512], index: 0, kind: input, shape index: {}]   ;;  %s373_s2 = inlined_call_operand.<no memory space> [shape: f32[1], index: 2, kind: input, shape index: {}]   ;;  %s374_s3 = inlined_call_operand.vmem [shape: f32[1,512], index: 3, kind: output, shape index: {0}]   ;;  %s375_s4 = inlined_call_operand.vmem [shape: f32[1,512], index: 4, kind: output, shape index: {1}]  }
   0x1   :  { %236 = vset.pattern.permute.xlu1 %v253_v0  ;;  %235 = vset.pattern.permute.xlu0 %v253_v0  ;;  %v35_v1 = vld [vmem:[%s371_s1 + $0x10] sm:$0xff]  ;;  %v33_v2 = vld [vmem:[%s371_s1] sm:$0xff]  ;;  %v36_v3 = vld [vmem:[%s371_s1 + $0x18] sm:$0xff] }
   0x2   :  { %49 = vperm.xlu1 %236, %v35_v1   ;;  %39 = vperm.xlu0 %235, %v33_v2   ;;  %v34_v4 = vld [vmem:[%s371_s1 + $0x8] sm:$0xff]  ;;  %v17_v7 = vld [vmem:[%s372_s0] sm:$0xff]  ;;  %v19_v10 = vld [vmem:[%s372_s0 + $0x10] sm:$0xff] }
   0x3   :  { %v18_v8 = vld [vmem:[%s372_s0 + $0x8] sm:$0xff]  ;;  %v25_v9 = vld [vmem:[%s372_s0 + $0x40] sm:$0xff]  ;;  %v20_v11 = vld [vmem:[%s372_s0 + $0x18] sm:$0xff] }
   0x4   :  { %v21_v12 = vld [vmem:[%s372_s0 + $0x20] sm:$0xff]  ;;  %v22_v13 = vld [vmem:[%s372_s0 + $0x28] sm:$0xff]  ;;  %v23_v14 = vld [vmem:[%s372_s0 + $0x30] sm:$0xff] }
   0x5   :  { %v24_v15 = vld [vmem:[%s372_s0 + $0x38] sm:$0xff]  ;;  %v26_v16 = vld [vmem:[%s372_s0 + $0x48] sm:$0xff]  ;;  %v27_v17 = vld [vmem:[%s372_s0 + $0x50] sm:$0xff] }
   0x6   :  { %v28_v18 = vld [vmem:[%s372_s0 + $0x58] sm:$0xff]  ;;  %v29_v24 = vld [vmem:[%s372_s0 + $0x60] sm:$0xff]  ;;  %v30_v26 = vld [vmem:[%s372_s0 + $0x68] sm:$0xff] }
   0x7   :  { %v31_v27 = vld [vmem:[%s372_s0 + $0x70] sm:$0xff]  ;;  %v32_v28 = vld [vmem:[%s372_s0 + $0x78] sm:$0xff] }
   0xa   :  { %54 = vperm.xlu1 %236, %v36_v3   ;;  %44 = vperm.xlu0 %235, %v34_v4  }
  0x74   :  { %v50_v5 = vpop.permute.xlu1 %49  ;;  %v40_v6 = vpop.permute.xlu0 %39 }
  0x75   :  { %v57_v20 = vmul.f32 %v40_v6, %v17_v7  ;;  %v58_v21 = vmul.f32 %v40_v6, %v18_v8  ;;  %v59_v22 = vmul.f32 %v40_v6, %v19_v10  ;;  %v60_v23 = vmul.f32 %v40_v6, %v20_v11 }
  0x76   :  { %v65_v33 = vmul.f32 %v50_v5, %v25_v9  ;;  %v66_v34 = vmul.f32 %v50_v5, %v26_v16  ;;  %v67_v35 = vmul.f32 %v50_v5, %v27_v17  ;;  %v68_v36 = vmul.f32 %v50_v5, %v28_v18 }
  0x77   :  { %v110_v9 = vstv %s373_s2  ;;  %v129_v10 = vlaneseq }
  0x79   :  { %vm342_vm3 = vcmp.lt.s32.totalorder %v129_v10, 512 }
  0x7c   :  { %v45_v19 = vpop.permute.xlu0 %44  ;;  %v55_v25 = vpop.permute.xlu1 %54 }
  0x7d   :  { %v61_v29 = vmul.f32 %v45_v19, %v21_v12  ;;  %v62_v30 = vmul.f32 %v45_v19, %v22_v13  ;;  %v63_v31 = vmul.f32 %v45_v19, %v23_v14  ;;  %v64_v32 = vmul.f32 %v45_v19, %v24_v15 }
  0x7e   :  { %v69_v41 = vmul.f32 %v55_v25, %v29_v24  ;;  %v70_v42 = vmul.f32 %v55_v25, %v30_v26  ;;  %v71_v43 = vmul.f32 %v55_v25, %v31_v27  ;;  %v72_v44 = vmul.f32 %v55_v25, %v32_v28 }
  0x7f   :  { %v73_v37 = vadd.f32 %v61_v29, %v57_v20  ;;  %v82_v38 = vadd.f32 %v62_v30, %v58_v21  ;;  %v91_v39 = vadd.f32 %v63_v31, %v59_v22  ;;  %v100_v40 = vadd.f32 %v64_v32, %v60_v23 }
  0x81   :  { %v74_v45 = vadd.f32 %v73_v37, %v65_v33  ;;  %v83_v46 = vadd.f32 %v82_v38, %v66_v34  ;;  %v92_v47 = vadd.f32 %v91_v39, %v67_v35  ;;  %v101_v48 = vadd.f32 %v100_v40, %v68_v36 }
  0x83   :  { %v75_v49 = vadd.f32 %v74_v45, %v69_v41  ;;  %v84_v50 = vadd.f32 %v83_v46, %v70_v42  ;;  %v93_v51 = vadd.f32 %v92_v47, %v71_v43  ;;  %v102_v52 = vadd.f32 %v101_v48, %v72_v44 }
  0x85   :  { %v76_v53 = vrot.slane %v75_v49, 4  ;;  %v85_v54 = vrot.slane %v84_v50, 4  ;;  %v94_v55 = vrot.slane %v93_v51, 4  ;;  %v103_v56 = vrot.slane %v102_v52, 4 }
  0x87   :  { %v77_v57 = vadd.f32 %v76_v53, %v75_v49  ;;  %v86_v58 = vadd.f32 %v85_v54, %v84_v50  ;;  %v95_v59 = vadd.f32 %v94_v55, %v93_v51  ;;  %v104_v60 = vadd.f32 %v103_v56, %v102_v52 }
  0x89   :  { %v78_v61 = vrot.slane %v77_v57, 2  ;;  %v87_v62 = vrot.slane %v86_v58, 2  ;;  %v96_v63 = vrot.slane %v95_v59, 2  ;;  %v105_v0 = vrot.slane %v104_v60, 2 }
  0x8b   :  { %v79_v1 = vadd.f32 %v78_v61, %v77_v57  ;;  %v88_v2 = vadd.f32 %v87_v62, %v86_v58  ;;  %v97_v3 = vadd.f32 %v96_v63, %v95_v59  ;;  %v106_v4 = vadd.f32 %v105_v0, %v104_v60 }
  0x8d   :  { %v80_v5 = vrot.slane %v79_v1, 1  ;;  %v89_v6 = vrot.slane %v88_v2, 1  ;;  %v98_v7 = vrot.slane %v97_v3, 1  ;;  %v107_v8 = vrot.slane %v106_v4, 1 }
  0x8f   :  { %v81_v11 = vadd.f32 %v80_v5, %v79_v1  ;;  %v90_v12 = vadd.f32 %v89_v6, %v88_v2  ;;  %v99_v13 = vadd.f32 %v98_v7, %v97_v3  ;;  %v108_v14 = vadd.f32 %v107_v8, %v106_v4 }
  0x91   :  { %v111_v15 = vadd.f32 %v110_v9, %v81_v11  ;;  %v112_v16 = vadd.f32 %v110_v9, %v90_v12  ;;  %v113_v17 = vadd.f32 %v110_v9, %v99_v13  ;;  %v114_v18 = vadd.f32 %v110_v9, %v108_v14 }
  0x93   :  { %v119_v20 = vrot.slane %v112_v16, 7  ;;  %v120_v21 = vrot.slane %v113_v17, 6  ;;  %v121_v22 = vrot.slane %v114_v18, 5  ;;  %v230_v23 = vmul.f32 -1.442695, %v111_v15 }
  0x94   :  { %v231_v24 = vmul.f32 -1.442695, %v112_v16  ;;  %v232_v25 = vmul.f32 -1.442695, %v113_v17  ;;  %v233_v26 = vmul.f32 -1.442695, %v114_v18 }
  0x95   :  { %v123_v27 = vsel %vm122_vm0, %v111_v15, %v119_v20  ;;  %v125_v28 = vsel %vm124_vm1, %v120_v21, %v121_v22  ;;  %237 = vpow2.f32 %v230_v23 }
  0x96   :  { %v127_v29 = vsel %vm376_vm2, %v123_v27, %v125_v28  ;;  %239 = vpow2.f32 %v231_v24 }
  0x97   :  { %133 = vst.msk [vmem:[%s374_s3] sm:$0xf] %vm342_vm3, %v127_v29  ;;  %241 = vpow2.f32 %v232_v25 }
  0x98   :  { %243 = vpow2.f32 %v233_v26 }
  0x9b   :  { %v238_v30 = vpop.eup %237 }
  0x9c   :  { %v240_v31 = vpop.eup %239  ;;  %v146_v32 = vadd.f32 1.0, %v238_v30 }
  0x9d   :  { %v242_v33 = vpop.eup %241  ;;  %v147_v34 = vadd.f32 1.0, %v240_v31 }
  0x9e   :  { %v244_v35 = vpop.eup %243  ;;  %v148_v36 = vadd.f32 1.0, %v242_v33  ;;  %245 = vrcp.f32 %v146_v32  ;;  %vm155_vm4 = vweird.f32 %v146_v32  ;;  %v159_v42 = vand.u32 2147483647, %v146_v32 }
  0x9f   :  { %v149_v37 = vadd.f32 1.0, %v244_v35  ;;  %247 = vrcp.f32 %v147_v34  ;;  %v161_v45 = vand.u32 2147483648, %v146_v32  ;;  %vm170_vm5 = vweird.f32 %v147_v34 }
  0xa0   :  { %249 = vrcp.f32 %v148_v36  ;;  %v174_v49 = vand.u32 2147483647, %v147_v34  ;;  %v176_v50 = vand.u32 2147483648, %v147_v34  ;;  %vm185_vm6 = vweird.f32 %v148_v36 }
  0xa1   :  { %251 = vrcp.f32 %v149_v37  ;;  %v189_v55 = vand.u32 2147483647, %v148_v36  ;;  %v191_v56 = vand.u32 2147483648, %v148_v36  ;;  %v206_v63 = vand.u32 2147483648, %v149_v37 }
  0xa2   :  { %vm175_vm11 = vcmp.eq.f32.partialorder %v174_v49, 8.507059e+37  ;;  %v177_v62 = vor.u32 1.1754944e-38, %v176_v50  ;;  %v204_v2 = vand.u32 2147483647, %v149_v37  ;;  %vm200_vm2 = vweird.f32 %v149_v37 }
  0xa3   :  { %vm190_vm15 = vcmp.eq.f32.partialorder %v189_v55, 8.507059e+37  ;;  %v192_v4 = vor.u32 1.1754944e-38, %v191_v56  ;;  %v162_v9 = vor.u32 1.1754944e-38, %v161_v45  ;;  %v207_v11 = vor.u32 1.1754944e-38, %v206_v63 }
  0xa4   :  { %v246_v38 = vpop.eup %245 }
  0xa5   :  { %v248_v39 = vpop.eup %247  ;;  %v151_v40 = vmul.f32 %v246_v38, %v146_v32  ;;  %vm156_vm7 = vweird.f32 %v246_v38 }
  0xa6   :  { %v250_v41 = vpop.eup %249  ;;  %v166_v43 = vmul.f32 %v248_v39, %v147_v34  ;;  %vm171_vm8 = vweird.f32 %v248_v39  ;;  %vm355_vm10 = vmor %vm155_vm4, %vm156_vm7  ;;  %vm205_vm7 = vcmp.eq.f32.partialorder %v204_v2, 8.507059e+37 }
  0xa7   :  { %v152_v44 = vsub.f32 1.0, %v151_v40  ;;  %v181_v46 = vmul.f32 %v250_v41, %v148_v36  ;;  %v252_v47 = vpop.eup %251  ;;  %vm186_vm9 = vweird.f32 %v250_v41  ;;  %vm172_vm12 = vmor %vm170_vm5, %vm171_vm8  ;;  %vm160_vm5 = vcmp.eq.f32.partialorder %v159_v42, 8.507059e+37 }
  0xa8   :  { %v167_v48 = vsub.f32 1.0, %v166_v43  ;;  %v196_v53 = vmul.f32 %v252_v47, %v149_v37  ;;  %vm201_vm13 = vweird.f32 %v252_v47  ;;  %vm187_vm14 = vmor %vm185_vm6, %vm186_vm9  ;;  %vm381_vm6 = vcmask 1041408  }
  0xa9   :  { %v153_v51 = vmul.f32 %v246_v38, %v152_v44  ;;  %v182_v52 = vsub.f32 1.0, %v181_v46  ;;  %vm202_vm4 = vmor %vm200_vm2, %vm201_vm13 }
  0xaa   :  { %v168_v54 = vmul.f32 %v248_v39, %v167_v48  ;;  %v197_v59 = vsub.f32 1.0, %v196_v53 }
  0xab   :  { %v154_v57 = vadd.f32 %v246_v38, %v153_v51  ;;  %v183_v58 = vmul.f32 %v250_v41, %v182_v52 }
  0xac   :  { %v169_v61 = vadd.f32 %v248_v39, %v168_v54  ;;  %v198_v1 = vmul.f32 %v252_v47, %v197_v59 }
  0xad   :  { %v184_v0 = vadd.f32 %v250_v41, %v183_v58  ;;  %v158_v5 = vsel %vm355_vm10, %v246_v38, %v154_v57 }
  0xae   :  { %v173_v3 = vsel %vm172_vm12, %v248_v39, %v169_v61  ;;  %v199_v8 = vadd.f32 %v252_v47, %v198_v1  ;;  %v163_v15 = vsel %vm160_vm5, %v162_v9, %v158_v5 }
  0xaf   :  { %v178_v6 = vsel %vm175_vm11, %v177_v62, %v173_v3  ;;  %v188_v7 = vsel %vm187_vm14, %v250_v41, %v184_v0 }
  0xb0   :  { %v193_v10 = vsel %vm190_vm15, %v192_v4, %v188_v7  ;;  %v214_v12 = vrot.slane %v178_v6, 7  ;;  %v203_v13 = vsel %vm202_vm4, %v252_v47, %v199_v8 }
  0xb1   :  { %v215_v14 = vrot.slane %v193_v10, 6  ;;  %v208_v16 = vsel %vm205_vm7, %v207_v11, %v203_v13 }
  0xb2   :  { %v216_v17 = vrot.slane %v208_v16, 5  ;;  %v217_v18 = vsel %vm122_vm0, %v163_v15, %v214_v12 }
  0xb4   :  { %v218_v20 = vsel %vm124_vm1, %v215_v14, %v216_v17 }
  0xb5   :  { %v219_v21 = vsel %vm381_vm6, %v217_v18, %v218_v20 }
  0xb6   :  { %221 = vst.msk [vmem:[%s375_s4] sm:$0xf] %vm342_vm3, %v219_v21 }

// kernel: mtsm_forward.14
= control target key start
LH: loop header
LB: loop body
LE: loop exit
PB: predicated region body
PF: predicated region fallthrough
CT: control target
= control target key end

     0   :  { %v135_v0 = vmov 0   ;;  %s218_s1 = inlined_call_operand.vmem [shape: f32[64,1], index: 1, kind: input, shape index: {}]   ;;  %s219_s0 = inlined_call_operand.vmem [shape: f32[64,128], index: 0, kind: input, shape index: {}]   ;;  %s220_s2 = inlined_call_operand.<no memory space> [shape: f32[1], index: 2, kind: input, shape index: {}]   ;;  %s221_s3 = inlined_call_operand.vmem [shape: f32[1,128], index: 3, kind: output, shape index: {0}]   ;;  %s222_s4 = inlined_call_operand.vmem [shape: f32[1,128], index: 4, kind: output, shape index: {1}]  }
   0x1   :  { %129 = vset.pattern.permute.xlu1 %v135_v0  ;;  %128 = vset.pattern.permute.xlu0 %v135_v0  ;;  %v27_v1 = vld [vmem:[%s218_s1 + $0x10] sm:$0xff]  ;;  %v25_v2 = vld [vmem:[%s218_s1] sm:$0xff]  ;;  %v28_v4 = vld [vmem:[%s218_s1 + $0x18] sm:$0xff]  ;;  %v95_v45 = vstv %s220_s2 }
   0x2   :  { %45 = vperm.xlu1 %129, %v27_v1   ;;  %35 = vperm.xlu0 %128, %v25_v2   ;;  %v29_v3 = vld [vmem:[%s218_s1 + $0x20] sm:$0xff]  ;;  %v26_v5 = vld [vmem:[%s218_s1 + $0x8] sm:$0xff]  ;;  %v32_v7 = vld [vmem:[%s218_s1 + $0x38] sm:$0xff] }
   0x3   :  { %130 = vset.pattern.permute.xlu2 %v135_v0  ;;  %v30_v6 = vld [vmem:[%s218_s1 + $0x28] sm:$0xff]  ;;  %v31_v8 = vld [vmem:[%s218_s1 + $0x30] sm:$0xff]  ;;  %v17_v12 = vld [vmem:[%s219_s0] sm:$0xff] }
   0x4   :  { %55 = vperm.xlu2 %130, %v29_v3   ;;  %v18_v13 = vld [vmem:[%s219_s0 + $0x8] sm:$0xff]  ;;  %v19_v14 = vld [vmem:[%s219_s0 + $0x10] sm:$0xff]  ;;  %v20_v19 = vld [vmem:[%s219_s0 + $0x18] sm:$0xff] }
   0x5   :  { %v21_v22 = vld [vmem:[%s219_s0 + $0x20] sm:$0xff]  ;;  %v22_v26 = vld [vmem:[%s219_s0 + $0x28] sm:$0xff]  ;;  %v23_v30 = vld [vmem:[%s219_s0 + $0x30] sm:$0xff] }
   0x6   :  { %v24_v34 = vld [vmem:[%s219_s0 + $0x38] sm:$0xff] }
   0xa   :  { %50 = vperm.xlu1 %129, %v28_v4   ;;  %40 = vperm.xlu0 %128, %v26_v5  }
   0xc   :  { %60 = vperm.xlu2 %130, %v30_v6  }
  0x12   :  { %70 = vperm.xlu1 %129, %v32_v7   ;;  %65 = vperm.xlu0 %128, %v31_v8  }
  0x5e   :  { %v56_v11 = vpop.permute.xlu2 %55 }
  0x5f   :  { %v77_v27 = vmul.f32 %v56_v11, %v21_v22 }
  0x66   :  { %v61_v25 = vpop.permute.xlu2 %60 }
  0x67   :  { %v78_v31 = vmul.f32 %v61_v25, %v22_v26 }
  0x74   :  { %v46_v9 = vpop.permute.xlu1 %45  ;;  %v36_v10 = vpop.permute.xlu0 %35 }
  0x75   :  { %v73_v17 = vmul.f32 %v36_v10, %v17_v12  ;;  %v75_v20 = vmul.f32 %v46_v9, %v19_v14 }
  0x7c   :  { %v51_v15 = vpop.permute.xlu1 %50  ;;  %v41_v16 = vpop.permute.xlu0 %40 }
  0x7d   :  { %v74_v18 = vmul.f32 %v41_v16, %v18_v13  ;;  %v76_v23 = vmul.f32 %v51_v15, %v20_v19 }
  0x7f   :  { %v81_v21 = vadd.f32 %v74_v18, %v73_v17 }
  0x81   :  { %v82_v24 = vadd.f32 %v81_v21, %v75_v20 }
  0x83   :  { %v83_v28 = vadd.f32 %v82_v24, %v76_v23 }
  0x84   :  { %v66_v29 = vpop.permute.xlu0 %65  ;;  %v71_v33 = vpop.permute.xlu1 %70 }
  0x85   :  { %v84_v32 = vadd.f32 %v83_v28, %v77_v27  ;;  %v79_v35 = vmul.f32 %v66_v29, %v23_v30  ;;  %v80_v37 = vmul.f32 %v71_v33, %v24_v34 }
  0x87   :  { %v85_v36 = vadd.f32 %v84_v32, %v78_v31 }
  0x89   :  { %v86_v38 = vadd.f32 %v85_v36, %v79_v35 }
  0x8b   :  { %v87_v39 = vadd.f32 %v86_v38, %v80_v37 }
  0x8d   :  { %v88_v40 = vrot.slane %v87_v39, 4 }
  0x8f   :  { %v89_v41 = vadd.f32 %v88_v40, %v87_v39 }
  0x91   :  { %v90_v42 = vrot.slane %v89_v41, 2 }
  0x93   :  { %v91_v43 = vadd.f32 %v90_v42, %v89_v41 }
  0x95   :  { %v92_v44 = vrot.slane %v91_v43, 1 }
  0x97   :  { %v93_v46 = vadd.f32 %v92_v44, %v91_v43 }
  0x99   :  { %v96_v47 = vadd.f32 %v95_v45, %v93_v46 }
  0x9b   :  { %97 = vst [vmem:[%s221_s3] sm:$0x1] %v96_v47  ;;  %v126_v48 = vmul.f32 -1.442695, %v96_v47 }
  0x9d   :  { %131 = vpow2.f32 %v126_v48 }
  0xa3   :  { %v132_v49 = vpop.eup %131 }
  0xa4   :  { %v101_v50 = vadd.f32 1.0, %v132_v49 }
  0xa6   :  { %133 = vrcp.f32 %v101_v50  ;;  %v113_v54 = vand.u32 2147483648, %v101_v50  ;;  %v111_v56 = vand.u32 2147483647, %v101_v50  ;;  %vm107_vm1 = vweird.f32 %v101_v50 }
  0xa8   :  { %v114_v58 = vor.u32 1.1754944e-38, %v113_v54  ;;  %vm112_vm3 = vcmp.eq.f32.partialorder %v111_v56, 8.507059e+37 }
  0xac   :  { %v134_v51 = vpop.eup %133 }
  0xad   :  { %v103_v52 = vmul.f32 %v134_v51, %v101_v50  ;;  %vm108_vm0 = vweird.f32 %v134_v51 }
  0xae   :  { %vm109_vm2 = vmor %vm107_vm1, %vm108_vm0 }
  0xaf   :  { %v104_v53 = vsub.f32 1.0, %v103_v52 }
  0xb1   :  { %v105_v55 = vmul.f32 %v134_v51, %v104_v53 }
  0xb3   :  { %v106_v57 = vadd.f32 %v134_v51, %v105_v55 }
  0xb5   :  { %v110_v59 = vsel %vm109_vm2, %v134_v51, %v106_v57 }
  0xb6   :  { %v115_v60 = vsel %vm112_vm3, %v114_v58, %v110_v59 }
  0xb7   :  { %117 = vst [vmem:[%s222_s4] sm:$0x1] %v115_v60 }

// kernel: mtsm_forward.15
= control target key start
LH: loop header
LB: loop body
LE: loop exit
PB: predicated region body
PF: predicated region fallthrough
CT: control target
= control target key end

     0   :  { %v225_v0 = vmov 0   ;;  %vm145_vm0 = vcmask 261120   ;;  %vm186_vm1 = vcmask 253952   ;;  %s374_s1 = inlined_call_operand.vmem [shape: f32[128,1], index: 1, kind: input, shape index: {}]   ;;  %s375_s0 = inlined_call_operand.vmem [shape: f32[128,32], index: 0, kind: input, shape index: {}]   ;;  %s376_s2 = inlined_call_operand.<no memory space> [shape: f32[1], index: 2, kind: input, shape index: {}]   ;;  %s377_s3 = inlined_call_operand.vmem [shape: f32[1,32], index: 3, kind: output, shape index: {0}]   ;;  %s378_s4 = inlined_call_operand.vmem [shape: f32[1,32], index: 4, kind: output, shape index: {1}]  }
   0x1   :  { %220 = vset.pattern.permute.xlu2 %v225_v0  ;;  %219 = vset.pattern.permute.xlu1 %v225_v0  ;;  %v37_v1 = vld [vmem:[%s374_s1 + $0x20] sm:$0xff]  ;;  %v35_v2 = vld [vmem:[%s374_s1 + $0x10] sm:$0xff]  ;;  %v38_v4 = vld [vmem:[%s374_s1 + $0x28] sm:$0xff] }
   0x2   :  { %v33_v3 = vld [vmem:[%s374_s1] sm:$0xff]  ;;  %218 = vset.pattern.permute.xlu0 %v225_v0  ;;  %71 = vperm.xlu2 %220, %v37_v1   ;;  %v36_v5 = vld [vmem:[%s374_s1 + $0x18] sm:$0xff]  ;;  %v34_v6 = vld [vmem:[%s374_s1 + $0x8] sm:$0xff] }
   0x3   :  { %61 = vperm.xlu1 %219, %v35_v2   ;;  %51 = vperm.xlu0 %218, %v33_v3   ;;  %v41_v7 = vld [vmem:[%s374_s1 + $0x40] sm:$0xff]  ;;  %v40_v8 = vld [vmem:[%s374_s1 + $0x38] sm:$0xff]  ;;  %v39_v9 = vld [vmem:[%s374_s1 + $0x30] sm:$0xff] }
   0x4   :  { %v44_v10 = vld [vmem:[%s374_s1 + $0x58] sm:$0xff]  ;;  %v43_v11 = vld [vmem:[%s374_s1 + $0x50] sm:$0xff]  ;;  %v42_v12 = vld [vmem:[%s374_s1 + $0x48] sm:$0xff] }
   0x5   :  { %v47_v13 = vld [vmem:[%s374_s1 + $0x70] sm:$0xff]  ;;  %v46_v14 = vld [vmem:[%s374_s1 + $0x68] sm:$0xff]  ;;  %v45_v15 = vld [vmem:[%s374_s1 + $0x60] sm:$0xff] }
   0x6   :  { %v48_v16 = vld [vmem:[%s374_s1 + $0x78] sm:$0xff]  ;;  %v17_v21 = vld [vmem:[%s375_s0] sm:$0xff]  ;;  %v19_v22 = vld [vmem:[%s375_s0 + $0x10] sm:$0xff] }
   0x7   :  { %v18_v23 = vld [vmem:[%s375_s0 + $0x8] sm:$0xff]  ;;  %v20_v26 = vld [vmem:[%s375_s0 + $0x18] sm:$0xff]  ;;  %v21_v30 = vld [vmem:[%s375_s0 + $0x20] sm:$0xff] }
   0x8   :  { %v22_v34 = vld [vmem:[%s375_s0 + $0x28] sm:$0xff]  ;;  %v23_v40 = vld [vmem:[%s375_s0 + $0x30] sm:$0xff]  ;;  %v24_v45 = vld [vmem:[%s375_s0 + $0x38] sm:$0xff] }
   0x9   :  { %v25_v49 = vld [vmem:[%s375_s0 + $0x40] sm:$0xff]  ;;  %v27_v57 = vld [vmem:[%s375_s0 + $0x50] sm:$0xff]  ;;  %v26_v58 = vld [vmem:[%s375_s0 + $0x48] sm:$0xff] }
   0xa   :  { %76 = vperm.xlu2 %220, %v38_v4   ;;  %v28_v3 = vld [vmem:[%s375_s0 + $0x58] sm:$0xff] }
   0xb   :  { %66 = vperm.xlu1 %219, %v36_v5   ;;  %56 = vperm.xlu0 %218, %v34_v6  }
  0x12   :  { %91 = vperm.xlu2 %220, %v41_v7  }
  0x13   :  { %86 = vperm.xlu1 %219, %v40_v8   ;;  %81 = vperm.xlu0 %218, %v39_v9  }
  0x1a   :  { %106 = vperm.xlu2 %220, %v44_v10   ;;  %v30_v10 = vld [vmem:[%s375_s0 + $0x68] sm:$0xff] }
  0x1b   :  { %101 = vperm.xlu1 %219, %v43_v11   ;;  %96 = vperm.xlu0 %218, %v42_v12   ;;  %v29_v11 = vld [vmem:[%s375_s0 + $0x60] sm:$0xff] }
  0x22   :  { %121 = vperm.xlu2 %220, %v47_v13  }
  0x23   :  { %116 = vperm.xlu1 %219, %v46_v14   ;;  %111 = vperm.xlu0 %218, %v45_v15  }
  0x2b   :  { %126 = vperm.xlu0 %218, %v48_v16  }
  0x5c   :  { %v72_v17 = vpop.permute.xlu2 %71 }
  0x5d   :  { %v133_v36 = vmul.f32 %v72_v17, %v21_v30 }
  0x5f   :  { %v153_v47 = vsel %vm145_vm0, %v133_v36, 0.0 }
  0x64   :  { %v77_v20 = vpop.permute.xlu2 %76 }
  0x65   :  { %v134_v41 = vmul.f32 %v77_v20, %v22_v34 }
  0x67   :  { %v155_v51 = vsel %vm145_vm0, %v134_v41, 0.0 }
  0x6c   :  { %v92_v37 = vpop.permute.xlu2 %91 }
  0x6d   :  { %v137_v54 = vmul.f32 %v92_v37, %v25_v49  ;;  %v184_v37 = vstv %s376_s2 }
  0x6f   :  { %v161_v0 = vsel %vm145_vm0, %v137_v54, 0.0 }
  0x74   :  { %v107_v59 = vpop.permute.xlu2 %106 }
  0x75   :  { %v62_v18 = vpop.permute.xlu1 %61  ;;  %v52_v19 = vpop.permute.xlu0 %51  ;;  %v140_v7 = vmul.f32 %v107_v59, %v28_v3 }
  0x76   :  { %v129_v24 = vmul.f32 %v52_v19, %v17_v21  ;;  %v131_v28 = vmul.f32 %v62_v18, %v19_v22  ;;  %v31_v18 = vld [vmem:[%s375_s0 + $0x70] sm:$0xff] }
  0x77   :  { %v167_v14 = vsel %vm145_vm0, %v140_v7, 0.0 }
  0x78   :  { %v146_v31 = vsel %vm145_vm0, %v129_v24, 0.0  ;;  %v149_v38 = vsel %vm145_vm0, %v131_v28, 0.0 }
  0x7c   :  { %v122_v17 = vpop.permute.xlu2 %121 }
  0x7d   :  { %v67_v25 = vpop.permute.xlu1 %66  ;;  %v57_v27 = vpop.permute.xlu0 %56  ;;  %v143_v22 = vmul.f32 %v122_v17, %v31_v18 }
  0x7e   :  { %v130_v29 = vmul.f32 %v57_v27, %v18_v23  ;;  %v132_v32 = vmul.f32 %v67_v25, %v20_v26  ;;  %v32_v25 = vld [vmem:[%s375_s0 + $0x78] sm:$0xff] }
  0x7f   :  { %v173_v27 = vsel %vm145_vm0, %v143_v22, 0.0 }
  0x80   :  { %v147_v33 = vsel %vm145_vm0, %v130_v29, 0.0  ;;  %v151_v42 = vsel %vm145_vm0, %v132_v32, 0.0 }
  0x81   :  { %v148_v35 = vadd.f32 %v147_v33, %v146_v31 }
  0x83   :  { %v150_v39 = vadd.f32 %v149_v38, %v148_v35 }
  0x85   :  { %v152_v43 = vadd.f32 %v151_v42, %v150_v39  ;;  %v87_v44 = vpop.permute.xlu1 %86  ;;  %v82_v46 = vpop.permute.xlu0 %81 }
  0x86   :  { %v135_v48 = vmul.f32 %v82_v46, %v23_v40  ;;  %v136_v52 = vmul.f32 %v87_v44, %v24_v45 }
  0x87   :  { %v154_v50 = vadd.f32 %v153_v47, %v152_v43 }
  0x88   :  { %v157_v55 = vsel %vm145_vm0, %v135_v48, 0.0  ;;  %v159_v60 = vsel %vm145_vm0, %v136_v52, 0.0 }
  0x89   :  { %v156_v53 = vadd.f32 %v155_v51, %v154_v50 }
  0x8b   :  { %v158_v56 = vadd.f32 %v157_v55, %v156_v53 }
  0x8d   :  { %v160_v61 = vadd.f32 %v159_v60, %v158_v56  ;;  %v102_v62 = vpop.permute.xlu1 %101  ;;  %v97_v63 = vpop.permute.xlu0 %96 }
  0x8e   :  { %v139_v1 = vmul.f32 %v102_v62, %v27_v57  ;;  %v138_v2 = vmul.f32 %v97_v63, %v26_v58 }
  0x8f   :  { %v162_v4 = vadd.f32 %v161_v0, %v160_v61 }
  0x90   :  { %v163_v5 = vsel %vm145_vm0, %v138_v2, 0.0  ;;  %v165_v8 = vsel %vm145_vm0, %v139_v1, 0.0 }
  0x91   :  { %v164_v6 = vadd.f32 %v163_v5, %v162_v4 }
  0x93   :  { %v166_v9 = vadd.f32 %v165_v8, %v164_v6 }
  0x95   :  { %v117_v12 = vpop.permute.xlu1 %116  ;;  %v112_v13 = vpop.permute.xlu0 %111  ;;  %v168_v19 = vadd.f32 %v167_v14, %v166_v9 }
  0x96   :  { %v142_v15 = vmul.f32 %v117_v12, %v30_v10  ;;  %v141_v16 = vmul.f32 %v112_v13, %v29_v11 }
  0x98   :  { %v169_v20 = vsel %vm145_vm0, %v141_v16, 0.0  ;;  %v171_v23 = vsel %vm145_vm0, %v142_v15, 0.0 }
  0x99   :  { %v170_v21 = vadd.f32 %v169_v20, %v168_v19 }
  0x9b   :  { %v172_v24 = vadd.f32 %v171_v23, %v170_v21 }
  0x9d   :  { %v127_v26 = vpop.permute.xlu0 %126  ;;  %v174_v29 = vadd.f32 %v173_v27, %v172_v24 }
  0x9e   :  { %v144_v28 = vmul.f32 %v127_v26, %v32_v25 }
  0xa0   :  { %v175_v30 = vsel %vm145_vm0, %v144_v28, 0.0 }
  0xa1   :  { %v176_v31 = vadd.f32 %v175_v30, %v174_v29 }
  0xa3   :  { %v177_v32 = vrot.slane %v176_v31, 4 }
  0xa5   :  { %v178_v33 = vadd.f32 %v177_v32, %v176_v31 }
  0xa7   :  { %v179_v34 = vrot.slane %v178_v33, 2 }
  0xa9   :  { %v180_v35 = vadd.f32 %v179_v34, %v178_v33 }
  0xab   :  { %v181_v36 = vrot.slane %v180_v35, 1 }
  0xad   :  { %v182_v38 = vadd.f32 %v181_v36, %v180_v35 }
  0xaf   :  { %v185_v39 = vadd.f32 %v184_v37, %v182_v38 }
  0xb1   :  { %187 = vst.msk [vmem:[%s377_s3] sm:$0x1] %vm186_vm1, %v185_v39  ;;  %v216_v40 = vmul.f32 -1.442695, %v185_v39 }
  0xb3   :  { %221 = vpow2.f32 %v216_v40 }
  0xb9   :  { %v222_v41 = vpop.eup %221 }
  0xba   :  { %v191_v42 = vadd.f32 1.0, %v222_v41 }
  0xbc   :  { %223 = vrcp.f32 %v191_v42  ;;  %v203_v46 = vand.u32 2147483648, %v191_v42  ;;  %v201_v48 = vand.u32 2147483647, %v191_v42  ;;  %vm197_vm3 = vweird.f32 %v191_v42 }
  0xbe   :  { %v204_v50 = vor.u32 1.1754944e-38, %v203_v46  ;;  %vm202_vm5 = vcmp.eq.f32.partialorder %v201_v48, 8.507059e+37 }
  0xc2   :  { %v224_v43 = vpop.eup %223 }
  0xc3   :  { %v193_v44 = vmul.f32 %v224_v43, %v191_v42  ;;  %vm198_vm2 = vweird.f32 %v224_v43 }
  0xc4   :  { %vm199_vm4 = vmor %vm197_vm3, %vm198_vm2 }
  0xc5   :  { %v194_v45 = vsub.f32 1.0, %v193_v44 }
  0xc7   :  { %v195_v47 = vmul.f32 %v224_v43, %v194_v45 }
  0xc9   :  { %v196_v49 = vadd.f32 %v224_v43, %v195_v47 }
  0xcb   :  { %v200_v51 = vsel %vm199_vm4, %v224_v43, %v196_v49 }
  0xcc   :  { %v205_v52 = vsel %vm202_vm5, %v204_v50, %v200_v51 }
  0xcd   :  { %207 = vst.msk [vmem:[%s378_s4] sm:$0x1] %vm186_vm1, %v205_v52 }

// kernel: mtsm_forward.16
= control target key start
LH: loop header
LB: loop body
LE: loop exit
PB: predicated region body
PF: predicated region fallthrough
CT: control target
= control target key end

     0   :  { %v225_v0 = vmov 0   ;;  %vm145_vm0 = vcmask 64512   ;;  %vm186_vm1 = vcmask 57344   ;;  %s374_s1 = inlined_call_operand.vmem [shape: f32[128,1], index: 1, kind: input, shape index: {}]   ;;  %s375_s0 = inlined_call_operand.vmem [shape: f32[128,8], index: 0, kind: input, shape index: {}]   ;;  %s376_s2 = inlined_call_operand.<no memory space> [shape: f32[1], index: 2, kind: input, shape index: {}]   ;;  %s377_s3 = inlined_call_operand.vmem [shape: f32[1,8], index: 3, kind: output, shape index: {0}]   ;;  %s378_s4 = inlined_call_operand.vmem [shape: f32[1,8], index: 4, kind: output, shape index: {1}]  }
   0x1   :  { %220 = vset.pattern.permute.xlu2 %v225_v0  ;;  %219 = vset.pattern.permute.xlu1 %v225_v0  ;;  %v37_v1 = vld [vmem:[%s374_s1 + $0x20] sm:$0xff]  ;;  %v35_v2 = vld [vmem:[%s374_s1 + $0x10] sm:$0xff]  ;;  %v38_v4 = vld [vmem:[%s374_s1 + $0x28] sm:$0xff] }
   0x2   :  { %v33_v3 = vld [vmem:[%s374_s1] sm:$0xff]  ;;  %218 = vset.pattern.permute.xlu0 %v225_v0  ;;  %71 = vperm.xlu2 %220, %v37_v1   ;;  %v36_v5 = vld [vmem:[%s374_s1 + $0x18] sm:$0xff]  ;;  %v34_v6 = vld [vmem:[%s374_s1 + $0x8] sm:$0xff] }
   0x3   :  { %61 = vperm.xlu1 %219, %v35_v2   ;;  %51 = vperm.xlu0 %218, %v33_v3   ;;  %v41_v7 = vld [vmem:[%s374_s1 + $0x40] sm:$0xff]  ;;  %v40_v8 = vld [vmem:[%s374_s1 + $0x38] sm:$0xff]  ;;  %v39_v9 = vld [vmem:[%s374_s1 + $0x30] sm:$0xff] }
   0x4   :  { %v44_v10 = vld [vmem:[%s374_s1 + $0x58] sm:$0xff]  ;;  %v43_v11 = vld [vmem:[%s374_s1 + $0x50] sm:$0xff]  ;;  %v42_v12 = vld [vmem:[%s374_s1 + $0x48] sm:$0xff] }
   0x5   :  { %v47_v13 = vld [vmem:[%s374_s1 + $0x70] sm:$0xff]  ;;  %v46_v14 = vld [vmem:[%s374_s1 + $0x68] sm:$0xff]  ;;  %v45_v15 = vld [vmem:[%s374_s1 + $0x60] sm:$0xff] }
   0x6   :  { %v48_v16 = vld [vmem:[%s374_s1 + $0x78] sm:$0xff]  ;;  %v17_v21 = vld [vmem:[%s375_s0] sm:$0xff]  ;;  %v19_v22 = vld [vmem:[%s375_s0 + $0x10] sm:$0xff] }
   0x7   :  { %v18_v23 = vld [vmem:[%s375_s0 + $0x8] sm:$0xff]  ;;  %v20_v26 = vld [vmem:[%s375_s0 + $0x18] sm:$0xff]  ;;  %v21_v30 = vld [vmem:[%s375_s0 + $0x20] sm:$0xff] }
   0x8   :  { %v22_v34 = vld [vmem:[%s375_s0 + $0x28] sm:$0xff]  ;;  %v23_v40 = vld [vmem:[%s375_s0 + $0x30] sm:$0xff]  ;;  %v24_v45 = vld [vmem:[%s375_s0 + $0x38] sm:$0xff] }
   0x9   :  { %v25_v49 = vld [vmem:[%s375_s0 + $0x40] sm:$0xff]  ;;  %v27_v57 = vld [vmem:[%s375_s0 + $0x50] sm:$0xff]  ;;  %v26_v58 = vld [vmem:[%s375_s0 + $0x48] sm:$0xff] }
   0xa   :  { %76 = vperm.xlu2 %220, %v38_v4   ;;  %v28_v3 = vld [vmem:[%s375_s0 + $0x58] sm:$0xff] }
   0xb   :  { %66 = vperm.xlu1 %219, %v36_v5   ;;  %56 = vperm.xlu0 %218, %v34_v6  }
  0x12   :  { %91 = vperm.xlu2 %220, %v41_v7  }
  0x13   :  { %86 = vperm.xlu1 %219, %v40_v8   ;;  %81 = vperm.xlu0 %218, %v39_v9  }
  0x1a   :  { %106 = vperm.xlu2 %220, %v44_v10   ;;  %v30_v10 = vld [vmem:[%s375_s0 + $0x68] sm:$0xff] }
  0x1b   :  { %101 = vperm.xlu1 %219, %v43_v11   ;;  %96 = vperm.xlu0 %218, %v42_v12   ;;  %v29_v11 = vld [vmem:[%s375_s0 + $0x60] sm:$0xff] }
  0x22   :  { %121 = vperm.xlu2 %220, %v47_v13  }
  0x23   :  { %116 = vperm.xlu1 %219, %v46_v14   ;;  %111 = vperm.xlu0 %218, %v45_v15  }
  0x2b   :  { %126 = vperm.xlu0 %218, %v48_v16  }
  0x5c   :  { %v72_v17 = vpop.permute.xlu2 %71 }
  0x5d   :  { %v133_v36 = vmul.f32 %v72_v17, %v21_v30 }
  0x5f   :  { %v153_v47 = vsel %vm145_vm0, %v133_v36, 0.0 }
  0x64   :  { %v77_v20 = vpop.permute.xlu2 %76 }
  0x65   :  { %v134_v41 = vmul.f32 %v77_v20, %v22_v34 }
  0x67   :  { %v155_v51 = vsel %vm145_vm0, %v134_v41, 0.0 }
  0x6c   :  { %v92_v37 = vpop.permute.xlu2 %91 }
  0x6d   :  { %v137_v54 = vmul.f32 %v92_v37, %v25_v49  ;;  %v184_v37 = vstv %s376_s2 }
  0x6f   :  { %v161_v0 = vsel %vm145_vm0, %v137_v54, 0.0 }
  0x74   :  { %v107_v59 = vpop.permute.xlu2 %106 }
  0x75   :  { %v62_v18 = vpop.permute.xlu1 %61  ;;  %v52_v19 = vpop.permute.xlu0 %51  ;;  %v140_v7 = vmul.f32 %v107_v59, %v28_v3 }
  0x76   :  { %v129_v24 = vmul.f32 %v52_v19, %v17_v21  ;;  %v131_v28 = vmul.f32 %v62_v18, %v19_v22  ;;  %v31_v18 = vld [vmem:[%s375_s0 + $0x70] sm:$0xff] }
  0x77   :  { %v167_v14 = vsel %vm145_vm0, %v140_v7, 0.0 }
  0x78   :  { %v146_v31 = vsel %vm145_vm0, %v129_v24, 0.0  ;;  %v149_v38 = vsel %vm145_vm0, %v131_v28, 0.0 }
  0x7c   :  { %v122_v17 = vpop.permute.xlu2 %121 }
  0x7d   :  { %v67_v25 = vpop.permute.xlu1 %66  ;;  %v57_v27 = vpop.permute.xlu0 %56  ;;  %v143_v22 = vmul.f32 %v122_v17, %v31_v18 }
  0x7e   :  { %v130_v29 = vmul.f32 %v57_v27, %v18_v23  ;;  %v132_v32 = vmul.f32 %v67_v25, %v20_v26  ;;  %v32_v25 = vld [vmem:[%s375_s0 + $0x78] sm:$0xff] }
  0x7f   :  { %v173_v27 = vsel %vm145_vm0, %v143_v22, 0.0 }
  0x80   :  { %v147_v33 = vsel %vm145_vm0, %v130_v29, 0.0  ;;  %v151_v42 = vsel %vm145_vm0, %v132_v32, 0.0 }
  0x81   :  { %v148_v35 = vadd.f32 %v147_v33, %v146_v31 }
  0x83   :  { %v150_v39 = vadd.f32 %v149_v38, %v148_v35 }
  0x85   :  { %v152_v43 = vadd.f32 %v151_v42, %v150_v39  ;;  %v87_v44 = vpop.permute.xlu1 %86  ;;  %v82_v46 = vpop.permute.xlu0 %81 }
  0x86   :  { %v135_v48 = vmul.f32 %v82_v46, %v23_v40  ;;  %v136_v52 = vmul.f32 %v87_v44, %v24_v45 }
  0x87   :  { %v154_v50 = vadd.f32 %v153_v47, %v152_v43 }
  0x88   :  { %v157_v55 = vsel %vm145_vm0, %v135_v48, 0.0  ;;  %v159_v60 = vsel %vm145_vm0, %v136_v52, 0.0 }
  0x89   :  { %v156_v53 = vadd.f32 %v155_v51, %v154_v50 }
  0x8b   :  { %v158_v56 = vadd.f32 %v157_v55, %v156_v53 }
  0x8d   :  { %v160_v61 = vadd.f32 %v159_v60, %v158_v56  ;;  %v102_v62 = vpop.permute.xlu1 %101  ;;  %v97_v63 = vpop.permute.xlu0 %96 }
  0x8e   :  { %v139_v1 = vmul.f32 %v102_v62, %v27_v57  ;;  %v138_v2 = vmul.f32 %v97_v63, %v26_v58 }
  0x8f   :  { %v162_v4 = vadd.f32 %v161_v0, %v160_v61 }
  0x90   :  { %v163_v5 = vsel %vm145_vm0, %v138_v2, 0.0  ;;  %v165_v8 = vsel %vm145_vm0, %v139_v1, 0.0 }
  0x91   :  { %v164_v6 = vadd.f32 %v163_v5, %v162_v4 }
  0x93   :  { %v166_v9 = vadd.f32 %v165_v8, %v164_v6 }
  0x95   :  { %v117_v12 = vpop.permute.xlu1 %116  ;;  %v112_v13 = vpop.permute.xlu0 %111  ;;  %v168_v19 = vadd.f32 %v167_v14, %v166_v9 }
  0x96   :  { %v142_v15 = vmul.f32 %v117_v12, %v30_v10  ;;  %v141_v16 = vmul.f32 %v112_v13, %v29_v11 }
  0x98   :  { %v169_v20 = vsel %vm145_vm0, %v141_v16, 0.0  ;;  %v171_v23 = vsel %vm145_vm0, %v142_v15, 0.0 }
  0x99   :  { %v170_v21 = vadd.f32 %v169_v20, %v168_v19 }
  0x9b   :  { %v172_v24 = vadd.f32 %v171_v23, %v170_v21 }
  0x9d   :  { %v127_v26 = vpop.permute.xlu0 %126  ;;  %v174_v29 = vadd.f32 %v173_v27, %v172_v24 }
  0x9e   :  { %v144_v28 = vmul.f32 %v127_v26, %v32_v25 }
  0xa0   :  { %v175_v30 = vsel %vm145_vm0, %v144_v28, 0.0 }
  0xa1   :  { %v176_v31 = vadd.f32 %v175_v30, %v174_v29 }
  0xa3   :  { %v177_v32 = vrot.slane %v176_v31, 4 }
  0xa5   :  { %v178_v33 = vadd.f32 %v177_v32, %v176_v31 }
  0xa7   :  { %v179_v34 = vrot.slane %v178_v33, 2 }
  0xa9   :  { %v180_v35 = vadd.f32 %v179_v34, %v178_v33 }
  0xab   :  { %v181_v36 = vrot.slane %v180_v35, 1 }
  0xad   :  { %v182_v38 = vadd.f32 %v181_v36, %v180_v35 }
  0xaf   :  { %v185_v39 = vadd.f32 %v184_v37, %v182_v38 }
  0xb1   :  { %187 = vst.msk [vmem:[%s377_s3] sm:$0x1] %vm186_vm1, %v185_v39  ;;  %v216_v40 = vmul.f32 -1.442695, %v185_v39 }
  0xb3   :  { %221 = vpow2.f32 %v216_v40 }
  0xb9   :  { %v222_v41 = vpop.eup %221 }
  0xba   :  { %v191_v42 = vadd.f32 1.0, %v222_v41 }
  0xbc   :  { %223 = vrcp.f32 %v191_v42  ;;  %v203_v46 = vand.u32 2147483648, %v191_v42  ;;  %v201_v48 = vand.u32 2147483647, %v191_v42  ;;  %vm197_vm3 = vweird.f32 %v191_v42 }
  0xbe   :  { %v204_v50 = vor.u32 1.1754944e-38, %v203_v46  ;;  %vm202_vm5 = vcmp.eq.f32.partialorder %v201_v48, 8.507059e+37 }
  0xc2   :  { %v224_v43 = vpop.eup %223 }
  0xc3   :  { %v193_v44 = vmul.f32 %v224_v43, %v191_v42  ;;  %vm198_vm2 = vweird.f32 %v224_v43 }
  0xc4   :  { %vm199_vm4 = vmor %vm197_vm3, %vm198_vm2 }
  0xc5   :  { %v194_v45 = vsub.f32 1.0, %v193_v44 }
  0xc7   :  { %v195_v47 = vmul.f32 %v224_v43, %v194_v45 }
  0xc9   :  { %v196_v49 = vadd.f32 %v224_v43, %v195_v47 }
  0xcb   :  { %v200_v51 = vsel %vm199_vm4, %v224_v43, %v196_v49 }
  0xcc   :  { %v205_v52 = vsel %vm202_vm5, %v204_v50, %v200_v51 }
  0xcd   :  { %207 = vst.msk [vmem:[%s378_s4] sm:$0x1] %vm186_vm1, %v205_v52 }

// kernel: mtsm_forward.17
= control target key start
LH: loop header
LB: loop body
LE: loop exit
PB: predicated region body
PF: predicated region fallthrough
CT: control target
= control target key end

     0   :  { %12 = vsyncpa [#allocation4], 0  ;;  %s144_s24 = smov [#allocation3]   ;;  %s216_s0 = inlined_call_operand.vmem [shape: f32[16,128], index: 0, kind: input, shape index: {}]   ;;  %s217_s1 = inlined_call_operand.vmem [shape: f32[16,128], index: 1, kind: input, shape index: {}]   ;;  %s218_s2 = inlined_call_operand.vmem [shape: f32[16,128], index: 2, kind: input, shape index: {}]   ;;  %s219_s3 = inlined_call_operand.vmem [shape: f32[16,128], index: 3, kind: input, shape index: {}]   ;;  %s220_s4 = inlined_call_operand.vmem [shape: f32[4], index: 4, kind: input, shape index: {}]   ;;  %s221_s5 = inlined_call_operand.<no memory space> [shape: f32[1], index: 5, kind: input, shape index: {}]   ;;  %s222_s6 = inlined_call_operand.vmem [shape: f32[16,128], index: 6, kind: output, shape index: {}]  }
   0x1   :  { %s26_s23 = sshll.u32 %s220_s4, 4  ;;  %s27_s23 = int_to_ptr.vmem [resolvable:$true] %s26_s23 }
   0x2   :  { %29 = dma.vmem_to_smem %s27_s23, 16, %s144_s24, [#allocation4]  }
   0x3   :  { %142 = dma.done.wait [#allocation4], 16  }
   0x4   :  { %143 = vsyncadd [#allocation4], 4294967280 }
   0x5   :  { %36 = sfence }
   0x6   :  { %s37_s25 = sld [smem:[#allocation3]]  ;;  %v38_v0 = vld [vmem:[%s216_s0] sm:$0xff]  ;;  %v39_v1 = vld [vmem:[%s216_s0 + $0x8] sm:$0xff]  ;;  %v68_v24 = vstv %s221_s5 }
   0x7   :  { %s116_s26 = sld [smem:[#allocation3 + $0x1]]  ;;  %v44_v2 = vld [vmem:[%s217_s1] sm:$0xff]  ;;  %v45_v3 = vld [vmem:[%s217_s1 + $0x8] sm:$0xff] }
   0x8   :  { %s117_s27 = sld [smem:[#allocation3 + $0x2]]  ;;  %v52_v5 = vld [vmem:[%s218_s2] sm:$0xff]  ;;  %v53_v6 = vld [vmem:[%s218_s2 + $0x8] sm:$0xff] }
   0x9   :  { %s118_s28 = sld [smem:[#allocation3 + $0x3]]  ;;  %v60_v9 = vld [vmem:[%s219_s3] sm:$0xff]  ;;  %v61_v11 = vld [vmem:[%s219_s3 + $0x8] sm:$0xff] }
   0xc   :  { %v40_v4 = vstv %s37_s25 }
   0xd   :  { %v41_v7 = vmul.f32 %v40_v4, %v38_v0  ;;  %v46_v8 = vstv %s116_s26  ;;  %v42_v10 = vmul.f32 %v40_v4, %v39_v1 }
   0xe   :  { %v47_v12 = vmul.f32 %v46_v8, %v44_v2  ;;  %v54_v13 = vstv %s117_s27  ;;  %v48_v14 = vmul.f32 %v46_v8, %v45_v3 }
   0xf   :  { %v55_v15 = vmul.f32 %v54_v13, %v52_v5  ;;  %v62_v16 = vstv %s118_s28  ;;  %v56_v17 = vmul.f32 %v54_v13, %v53_v6 }
  0x10   :  { %v49_v18 = vadd.f32 %v47_v12, %v41_v7  ;;  %v63_v19 = vmul.f32 %v62_v16, %v60_v9  ;;  %v50_v20 = vadd.f32 %v48_v14, %v42_v10  ;;  %v64_v21 = vmul.f32 %v62_v16, %v61_v11 }
  0x12   :  { %v57_v22 = vadd.f32 %v55_v15, %v49_v18  ;;  %v58_v23 = vadd.f32 %v56_v17, %v50_v20 }
  0x14   :  { %v65_v25 = vadd.f32 %v63_v19, %v57_v22  ;;  %v66_v26 = vadd.f32 %v64_v21, %v58_v23 }
  0x16   :  { %v69_v27 = vadd.f32 %v68_v24, %v65_v25  ;;  %v70_v28 = vadd.f32 %v68_v24, %v66_v26 }
  0x18   :  { %v119_v29 = vmul.f32 -1.442695, %v69_v27  ;;  %v120_v30 = vmul.f32 -1.442695, %v70_v28 }
  0x1a   :  { %122 = vpow2.f32 %v119_v29 }
  0x1b   :  { %124 = vpow2.f32 %v120_v30 }
  0x20   :  { %v123_v31 = vpop.eup %122 }
  0x21   :  { %v125_v32 = vpop.eup %124  ;;  %v77_v33 = vadd.f32 1.0, %v123_v31 }
  0x22   :  { %v78_v34 = vadd.f32 1.0, %v125_v32 }
  0x23   :  { %126 = vrcp.f32 %v77_v33  ;;  %vm84_vm0 = vweird.f32 %v77_v33  ;;  %v90_v38 = vand.u32 2147483648, %v77_v33  ;;  %v88_v41 = vand.u32 2147483647, %v77_v33 }
  0x24   :  { %128 = vrcp.f32 %v78_v34  ;;  %v105_v42 = vand.u32 2147483648, %v78_v34  ;;  %vm99_vm2 = vweird.f32 %v78_v34  ;;  %v103_v44 = vand.u32 2147483647, %v78_v34 }
  0x25   :  { %v91_v46 = vor.u32 1.1754944e-38, %v90_v38  ;;  %vm89_vm5 = vcmp.eq.f32.partialorder %v88_v41, 8.507059e+37 }
  0x26   :  { %v106_v49 = vor.u32 1.1754944e-38, %v105_v42  ;;  %vm104_vm7 = vcmp.eq.f32.partialorder %v103_v44, 8.507059e+37 }
  0x29   :  { %v127_v35 = vpop.eup %126 }
  0x2a   :  { %v129_v36 = vpop.eup %128  ;;  %v80_v37 = vmul.f32 %v127_v35, %v77_v33  ;;  %vm85_vm1 = vweird.f32 %v127_v35 }
  0x2b   :  { %v95_v39 = vmul.f32 %v129_v36, %v78_v34  ;;  %vm100_vm3 = vweird.f32 %v129_v36  ;;  %vm86_vm4 = vmor %vm84_vm0, %vm85_vm1 }
  0x2c   :  { %v81_v40 = vsub.f32 1.0, %v80_v37  ;;  %vm101_vm6 = vmor %vm99_vm2, %vm100_vm3 }
  0x2d   :  { %v96_v43 = vsub.f32 1.0, %v95_v39 }
  0x2e   :  { %v82_v45 = vmul.f32 %v127_v35, %v81_v40 }
  0x2f   :  { %v97_v47 = vmul.f32 %v129_v36, %v96_v43 }
  0x30   :  { %v83_v48 = vadd.f32 %v127_v35, %v82_v45 }
  0x31   :  { %v98_v50 = vadd.f32 %v129_v36, %v97_v47 }
  0x32   :  { %v87_v51 = vsel %vm86_vm4, %v127_v35, %v83_v48 }
  0x33   :  { %v92_v52 = vsel %vm89_vm5, %v91_v46, %v87_v51  ;;  %v102_v53 = vsel %vm101_vm6, %v129_v36, %v98_v50 }
  0x34   :  { %109 = vst [vmem:[%s222_s6] sm:$0xff] %v92_v52  ;;  %v107_v54 = vsel %vm104_vm7, %v106_v49, %v102_v53 }
  0x35   :  { %110 = vst [vmem:[%s222_s6 + $0x8] sm:$0xff] %v107_v54 }
  0x36   :  { %115 = vsyncpa [#allocation4], 1 }

</bundles_post_ra>
